<compile_context>
chip_gen: v7x
topology: tpu7x:2x2x1
jax: 0.10.0
libtpu: 0.0.40
codegen_flags: <defaults>
</compile_context>

<pallas_src>
import functools

import jax
import jax.numpy as jnp
from jax.experimental import pallas as pl
from jax.experimental.pallas import tpu as pltpu

NUM_CLASSES = 21


def _round_up(x, m):
    return (x + m - 1) // m * m


def _detect_big_vmem():
    # v5e / v6e: 128 MiB VMEM per TensorCore (1 TC/chip); v7x: 64 MiB (2 TC/chip).
    try:
        return int(pltpu.get_tpu_info().vmem_capacity_bytes) >= 96 * 1024 * 1024
    except Exception:
        return False


_BIG_VMEM = _detect_big_vmem()
_VMEM_LIMIT = (100 << 20) if _BIG_VMEM else (48 << 20)


# ----------------------------------------------------------------------------
# Fused GEMM + bias + activation (1x1 convs and small im2col fallbacks)
# ----------------------------------------------------------------------------
def _gemm_kernel(a_ref, w_ref, b_ref, o_ref, *, relu):
    acc = jnp.dot(a_ref[...], w_ref[...], preferred_element_type=jnp.float32)
    acc = acc + b_ref[...]
    if relu:
        acc = jnp.maximum(acc, 0.0)
    o_ref[...] = acc.astype(o_ref.dtype)


def gemm_bias_act(a, w, b, relu):
    """out = act(a @ w + b); a:(M,K), w:(K,N) -> (M,N) bf16, f32 accumulation."""
    M, K = a.shape
    N = w.shape[1]
    a = a.astype(jnp.bfloat16)
    w = w.astype(jnp.bfloat16)
    b2 = b.reshape(1, N).astype(jnp.float32)

    kpad = _round_up(K, 128)
    npad = _round_up(N, 128)
    blk = (6 << 20) if _BIG_VMEM else (2 << 20)      # per-operand block budget
    tm = blk // (2 * max(kpad, npad))
    tm = max(8, (tm // 8) * 8)
    tm = min(tm, _round_up(M, 8))
    tn = min(512, N) if N % 128 == 0 else N

    out = pl.pallas_call(
        functools.partial(_gemm_kernel, relu=relu),
        out_shape=jax.ShapeDtypeStruct((M, N), jnp.bfloat16),
        grid_spec=pltpu.PrefetchScalarGridSpec(
            num_scalar_prefetch=0,
            grid=(pl.cdiv(M, tm), pl.cdiv(N, tn)),
            in_specs=[
                pl.BlockSpec((tm, K), lambda i, j: (i, 0)),
                pl.BlockSpec((K, tn), lambda i, j: (0, j)),
                pl.BlockSpec((1, tn), lambda i, j: (0, j)),
            ],
            out_specs=pl.BlockSpec((tm, tn), lambda i, j: (i, j)),
        ),
        compiler_params=pltpu.CompilerParams(
            dimension_semantics=("parallel", "parallel"),
            vmem_limit_bytes=_VMEM_LIMIT),
    )(a, w, b2)
    return out


# ----------------------------------------------------------------------------
# Fused, im2col-free 3x3 stride-1 convolution (K-folded taps, aligned MXU feeds)
# ----------------------------------------------------------------------------
def _conv3x3_kernel(xm_ref, xh_ref, w_ref, b_ref, o_ref, lhs_ref, *,
                    th, wp, wo, cin, cstride, relu):
    n_main = th * wp
    n_halo = 2 * wp

    if cstride != cin:
        # Folded-K lanes [cin, cstride) per tap never get written with data;
        # zero the scratch once so they contribute exactly 0 to every dot
        # (the matching weight rows are zero-padded on the host side).
        @pl.when(pl.program_id(0) == 0)
        def _():
            lhs_ref[...] = jnp.zeros(lhs_ref.shape, lhs_ref.dtype)

    # K-folded LHS assembly with a WRITE-side width shift:
    #   lhs[8 - dj + s, dj*cstride + c] = window[s, c]
    # => lhs[8 + q + di*wp, dj*cstride + c] == window[q + di*wp + dj, c],
    # so all three MXU lhs slices below start at multiples of 8 (wp % 8 == 0).
    for dj in range(3):
        lo = dj * cstride
        lhs_ref[pl.ds(8 - dj, n_main), lo:lo + cin] = xm_ref[...]
        lhs_ref[pl.ds(8 - dj + n_main, n_halo), lo:lo + cin] = xh_ref[...]

    # Three MXU dots with K = 3*cstride, accumulated in a single f32 chain.
    acc = jnp.dot(lhs_ref[pl.ds(8, n_main), :], w_ref[0],
                  preferred_element_type=jnp.float32)
    acc = acc + jnp.dot(lhs_ref[pl.ds(8 + wp, n_main), :], w_ref[1],
                        preferred_element_type=jnp.float32)
    acc = acc + jnp.dot(lhs_ref[pl.ds(8 + 2 * wp, n_main), :], w_ref[2],
                        preferred_element_type=jnp.float32)
    acc = acc + b_ref[...]
    if relu:
        acc = jnp.maximum(acc, 0.0)
    y = acc.astype(o_ref.dtype)

    # Drop the (wp - wo) junk columns row by row (all slice starts are 8-aligned).
    for o in range(th):
        o_ref[o] = y[o * wp:o * wp + wo, :]


def _pick_th(ho, wp, cin, cout):
    if _BIG_VMEM:                                   # v5e / v6e: 128 MiB VMEM
        in_cap, acc_cap, th_cap = 4 << 20, 8 << 20, 96
    else:                                           # v7x (or unknown): 64 MiB
        in_cap, acc_cap, th_cap = 3 << 19, 3 << 20, 48
    cap_in = max(2, in_cap // (wp * cin * 2))       # main bf16 block budget
    cap_acc = max(2, acc_cap // (wp * cout * 4))    # f32 accumulator budget
    th = min(cap_in, cap_acc, th_cap, ho + (ho % 2))
    th = max(2, th - (th % 2))                      # even, >= 2
    if (not _BIG_VMEM) and ho >= 4 and pl.cdiv(ho, th) < 2:
        # v7x has 2 TensorCores: keep >= 2 row blocks so the parallel grid
        # axis can be sharded across them.  Not forced on single-TC v5e/v6e.
        th = max(2, ((ho + 3) // 4) * 2)
    return th


def conv3x3_s1(x, weight, bias, padding, relu):
    """Fused 3x3 stride-1 conv.  x:(H,W,Cin) -> (Ho,Wo,Cout), bf16 out."""
    H, W, Cin = x.shape
    Cout = weight.shape[0]
    p = padding
    Ho, Wo = H + 2 * p - 2, W + 2 * p - 2
    Wp = _round_up(W + 2 * p, 8)                    # lane/sublane friendly width
    th = _pick_th(Ho, Wp, Cin, Cout)
    nr = pl.cdiv(Ho, th)
    Hp = nr * th + 2                                # rows incl. halo head-room
    half = th // 2
    n_main = th * Wp
    cstride = _round_up(Cin, 128)                   # 128-aligned folded-K stride

    xp = jnp.pad(x.astype(jnp.bfloat16),
                 ((p, Hp - H - p), (p, Wp - W - p), (0, 0)))
    x2 = xp.reshape(Hp * Wp, Cin)                   # free reshape

    wt = jnp.transpose(weight, (2, 3, 1, 0))        # (di, dj, Cin, Cout)
    if cstride != Cin:
        wt = jnp.pad(wt, ((0, 0), (0, 0), (0, cstride - Cin), (0, 0)))
    wf = wt.reshape(3, 3 * cstride, Cout).astype(jnp.bfloat16)
    b2 = bias.reshape(1, Cout).astype(jnp.float32)

    # Scratch zero-init (needed when cstride != Cin) happens at program_id==0
    # only, so don't shard that grid axis across TensorCores in that case.
    dim_sem = ("parallel",) if cstride == Cin else ("arbitrary",)

    out = pl.pallas_call(
        functools.partial(_conv3x3_kernel, th=th, wp=Wp, wo=Wo, cin=Cin,
                          cstride=cstride, relu=relu),
        out_shape=jax.ShapeDtypeStruct((Ho, Wo, Cout), jnp.bfloat16),
        grid_spec=pltpu.PrefetchScalarGridSpec(
            num_scalar_prefetch=0,
            grid=(nr,),
            in_specs=[
                pl.BlockSpec((n_main, Cin), lambda r: (r, 0)),               # main rows
                pl.BlockSpec((2 * Wp, Cin), lambda r: ((r + 1) * half, 0)),  # 2-row halo
                pl.BlockSpec((3, 3 * cstride, Cout), lambda r: (0, 0, 0)),   # folded weights
                pl.BlockSpec((1, Cout), lambda r: (0, 0)),                   # bias
            ],
            out_specs=pl.BlockSpec((th, Wo, Cout), lambda r: (r, 0, 0)),
            scratch_shapes=[
                pltpu.VMEM((8 + n_main + 2 * Wp, 3 * cstride), jnp.bfloat16)],
        ),
        compiler_params=pltpu.CompilerParams(
            dimension_semantics=dim_sem,
            vmem_limit_bytes=_VMEM_LIMIT),
    )(x2, x2, wf, b2)
    return out


# ----------------------------------------------------------------------------
# MaxPool 2x2 / stride 2 (floor mode) -- single Pallas kernel
# ----------------------------------------------------------------------------
def _pool_kernel(x_ref, o_ref, *, c):
    x = x_ref[...]                        # (th, 2, Wo, 2C)
    v = jnp.maximum(x[:, 0], x[:, 1])     # vertical pair max -> (th, Wo, 2C)
    o_ref[...] = jnp.maximum(v[:, :, :c], v[:, :, c:])   # horizontal pair max


def maxpool2x2(x):
    H, W, C = x.shape
    Ho, Wo = H // 2, W // 2
    x = x[:2 * Ho, :2 * Wo, :]            # floor mode (only copies if odd)
    xr = x.reshape(Ho, 2, Wo, 2 * C)      # free reshape, lane dim 2C >= 128
    row_bytes = 2 * Wo * 2 * C * x.dtype.itemsize
    blk = (6 << 20) if _BIG_VMEM else (2 << 20)
    th = max(1, min(Ho, blk // row_bytes))
    if (not _BIG_VMEM) and Ho >= 2 and pl.cdiv(Ho, th) < 2:
        th = (Ho + 1) // 2                # keep >=2 blocks for v7x megacore only
    out = pl.pallas_call(
        functools.partial(_pool_kernel, c=C),
        out_shape=jax.ShapeDtypeStruct((Ho, Wo, C), x.dtype),
        grid=(pl.cdiv(Ho, th),),
        in_specs=[pl.BlockSpec((th, 2, Wo, 2 * C), lambda r: (r, 0, 0, 0))],
        out_specs=pl.BlockSpec((th, Wo, C), lambda r: (r, 0, 0)),
        compiler_params=pltpu.CompilerParams(
            dimension_semantics=("parallel",),
            vmem_limit_bytes=_VMEM_LIMIT),
    )(xr)
    return out


# ----------------------------------------------------------------------------
# Convolution dispatch (1x1 GEMM / fused 3x3 / small im2col fallback)
# ----------------------------------------------------------------------------
def conv2d_im2col(x, weight, bias, stride, padding, relu):
    H, W, C = x.shape
    Cout, Cin, kh, kw = weight.shape
    if padding > 0:
        x = jnp.pad(x, ((padding, padding), (padding, padding), (0, 0)))
    Hp, Wpad = x.shape[0], x.shape[1]
    Ho = (Hp - kh) // stride + 1
    Wo = (Wpad - kw) // stride + 1
    cols = []
    for i in range(kh):
        for j in range(kw):
            cols.append(x[i:i + stride * Ho:stride,
                          j:j + stride * Wo:stride, :])
    patches = jnp.concatenate(cols, axis=-1).reshape(Ho * Wo, kh * kw * Cin)
    w_mat = jnp.transpose(weight, (2, 3, 1, 0)).reshape(kh * kw * Cin, Cout)
    out = gemm_bias_act(patches, w_mat, bias, relu)
    return out.reshape(Ho, Wo, Cout)


def conv2d(x, weight, bias, stride=1, padding=0, relu=False):
    Cout, Cin, kh, kw = weight.shape
    if kh == 1 and kw == 1 and stride == 1 and padding == 0:
        H, W, _ = x.shape
        a = x.reshape(H * W, Cin)
        w_mat = jnp.transpose(weight.reshape(Cout, Cin), (1, 0))
        return gemm_bias_act(a, w_mat, bias, relu).reshape(H, W, Cout)
    if kh == 3 and kw == 3 and stride == 1 and Cin % 8 == 0:
        return conv3x3_s1(x, weight, bias, padding, relu)
    # tiny stride-2 convs and the Cin=3 first conv
    return conv2d_im2col(x, weight, bias, stride, padding, relu)


# ----------------------------------------------------------------------------
# Deterministic parameter construction (shapes from SSD.__init__)
# ----------------------------------------------------------------------------
VGG_CFG = [(3, 64), (64, 64), "M",
           (64, 128), (128, 128), "M",
           (128, 256), (256, 256), (256, 256), "M",
           (256, 512), (512, 512), (512, 512), "M",
           (512, 512), (512, 512), (512, 512)]

EXTRAS_CFG = [
    [(512, 1024, 3, 1, 1)],
    [(1024, 256, 1, 1, 0), (256, 512, 3, 2, 1)],
    [(512, 128, 1, 1, 0), (128, 256, 3, 2, 1)],
    [(256, 128, 1, 1, 0), (128, 256, 3, 1, 0)],
    [(256, 128, 1, 1, 0), (128, 256, 3, 1, 0)],
]

HEAD_IN = [512, 1024, 512, 256, 256, 256]
BOXES = [4, 6, 6, 6, 4, 4]


def _init_conv(key, cout, cin, k):
    fan_in = cin * k * k
    w = jax.random.normal(key, (cout, cin, k, k), jnp.float32) * jnp.sqrt(
        2.0 / fan_in)
    b = jnp.zeros((cout,), jnp.float32)
    return w, b


def build_params(seed=0):
    key = jax.random.PRNGKey(seed)
    keys = iter(jax.random.split(key, 64))

    features = []
    for c in VGG_CFG:
        if c == "M":
            continue
        cin, cout = c
        features.append(_init_conv(next(keys), cout, cin, 3))

    extras = []
    for block in EXTRAS_CFG:
        layers = []
        for cin, cout, k, s, p in block:
            layers.append(_init_conv(next(keys), cout, cin, k))
        extras.append(layers)

    heads = []
    for cin, nb in zip(HEAD_IN, BOXES):
        lw, lb = _init_conv(next(keys), nb * 4, cin, 3)
        cw, cb = _init_conv(next(keys), nb * NUM_CLASSES, cin, 3)
        # Fuse loc+conf heads into one conv; zero-pad Cout to a multiple of 128
        # so the output store path is lane-dense (padding sliced off outside).
        w = jnp.concatenate([lw, cw], axis=0)
        b = jnp.concatenate([lb, cb], axis=0)
        cout_real = nb * (4 + NUM_CLASSES)
        cout_pad = _round_up(cout_real, 128)
        if cout_pad != cout_real:
            w = jnp.pad(w, ((0, cout_pad - cout_real), (0, 0), (0, 0), (0, 0)))
            b = jnp.pad(b, ((0, cout_pad - cout_real),))
        heads.append((w, b))

    return {"features": features, "extras": extras, "heads": heads}


# ----------------------------------------------------------------------------
# SSD forward
# ----------------------------------------------------------------------------
def ssd_forward(x_nchw, params):
    x = jnp.transpose(x_nchw[0], (1, 2, 0)).astype(jnp.bfloat16)  # CHW -> HWC

    conv_iter = iter(params["features"])
    for c in VGG_CFG:                       # vgg16.features[:30]
        if c == "M":
            x = maxpool2x2(x)
        else:
            w, b = next(conv_iter)
            x = conv2d(x, w, b, stride=1, padding=1, relu=True)

    feats = [x]
    src = x
    for block_cfg, block_params in zip(EXTRAS_CFG, params["extras"]):
        for (_, _, k, s, p), (w, b) in zip(block_cfg, block_params):
            src = conv2d(src, w, b, stride=s, padding=p, relu=True)
        feats.append(src)

    locs, confs = [], []
    for f, (hw, hb), nb in zip(feats, params["heads"], BOXES):
        out = conv2d(f, hw, hb, stride=1, padding=1, relu=False)
        creal = nb * (4 + NUM_CLASSES)
        out = out[..., :creal]              # drop lane-pad Cout columns
        # conv output already HWC == PyTorch's .permute(0, 2, 3, 1)
        locs.append(out[..., :nb * 4].reshape(1, -1).astype(jnp.float32))
        confs.append(out[..., nb * 4:].reshape(1, -1).astype(jnp.float32))

    locs = jnp.concatenate(locs, axis=1).reshape(1, -1, 4)
    confs = jnp.concatenate(confs, axis=1).reshape(1, -1, NUM_CLASSES)
    return locs, confs


# ----------------------------------------------------------------------------
if __name__ == "__main__":
    # Small self-check of the fused 3x3 kernel against lax.conv (bf16 tolerance).
    kx, kw = jax.random.split(jax.random.PRNGKey(1))
    xs = jax.random.normal(kx, (13, 13, 16), jnp.float32)
    ws = jax.random.normal(kw, (32, 16, 3, 3), jnp.float32) * 0.1
    bs = jnp.linspace(-0.5, 0.5, 32, dtype=jnp.float32)
    got = conv3x3_s1(xs, ws, bs, padding=1, relu=True).astype(jnp.float32)
    xb = xs.astype(jnp.bfloat16).astype(jnp.float32)
    wb = ws.astype(jnp.bfloat16).astype(jnp.float32)
    ref = jax.lax.conv_general_dilated(
        xb[None], wb, (1, 1), ((1, 1), (1, 1)),
        dimension_numbers=("NHWC", "OIHW", "NHWC"))[0] + bs
    ref = jnp.maximum(ref, 0.0)
    err = float(jnp.max(jnp.abs(got - ref)))
    scale = float(jnp.max(jnp.abs(ref))) + 1.0
    assert err <= 0.05 * scale, (err, scale)

    params = build_params(seed=0)
    x = jax.random.normal(jax.random.PRNGKey(0), (1, 3, 300, 300), jnp.float32)

    fwd = jax.jit(ssd_forward)
    locs, confs = fwd(x, params)
    locs, confs = jax.block_until_ready((locs, confs))

    # Prior-box count for a 300x300 input with floor-mode pooling:
    # 18^2*4 + 18^2*6 + 9^2*6 + 5^2*6 + 3^2*4 + 1^2*4 = 3916
    assert locs.shape == (1, 3916, 4), locs.shape
    assert confs.shape == (1, 3916, NUM_CLASSES), confs.shape
    assert bool(jnp.isfinite(locs).all()) and bool(jnp.isfinite(confs).all())

    print("KERNEL_OK")
</pallas_src>

<mosaic_0001>
module attributes {stable_mosaic.version = 11 : i64} {
  func.func @_conv3x3_kernel(%arg0: i32, %arg1: memref<128x16xbf16, #tpu.memory_space<vmem>>, %arg2: memref<32x16xbf16, #tpu.memory_space<vmem>>, %arg3: memref<3x384x32xbf16, #tpu.memory_space<vmem>>, %arg4: memref<1x32xf32, #tpu.memory_space<vmem>>, %arg5: memref<8x13x32xbf16, #tpu.memory_space<vmem>>, %arg6: memref<168x384xbf16, #tpu.memory_space<vmem>>) attributes {dimension_semantics = [#tpu.dimension_semantics<arbitrary>], iteration_bounds = array<i64: 2>, scalar_prefetch = 0 : i64, scratch_operands = 1 : i64, tpu.core_type = #tpu.core_type<tc>, window_params = [{transform_indices = @transform_0, window_bounds = array<i64: 128, 16>}, {transform_indices = @transform_1, window_bounds = array<i64: 32, 16>}, {pipeline_mode = #tpu.pipeline_mode<synchronous>, transform_indices = @transform_2, window_bounds = array<i64: 3, 384, 32>}, {pipeline_mode = #tpu.pipeline_mode<synchronous>, transform_indices = @transform_3, window_bounds = array<i64: 1, 32>}, {transform_indices = @transform_4, window_bounds = array<i64: 8, 13, 32>}]} {
    %c0_i32 = arith.constant 0 : i32
    %0 = arith.cmpi eq, %arg0, %c0_i32 : i32
    %1 = arith.extui %0 : i1 to i32
    %c0_i32_0 = arith.constant 0 : i32
    %2 = arith.cmpi ne, %1, %c0_i32_0 : i32
    scf.if %2 {
      %cst_53 = arith.constant 0.000000e+00 : bf16
      %67 = vector.broadcast %cst_53 : bf16 to vector<168x384xbf16>
      %c0_54 = arith.constant 0 : index
      %c0_55 = arith.constant 0 : index
      %68 = vector.load %arg6[%c0_54, %c0_55] : memref<168x384xbf16, #tpu.memory_space<vmem>>, vector<168x384xbf16>
      tpu.vector_store %arg6[%c0_54, %c0_55], %67 {strides = array<i32>} : memref<168x384xbf16, #tpu.memory_space<vmem>>, vector<168x384xbf16>,
    } else {
    }
    %c0 = arith.constant 0 : index
    %c0_1 = arith.constant 0 : index
    %3 = vector.load %arg1[%c0, %c0_1] : memref<128x16xbf16, #tpu.memory_space<vmem>>, vector<128x16xbf16>
    %c8 = arith.constant 8 : index
    %c0_2 = arith.constant 0 : index
    %4 = vector.load %arg6[%c8, %c0_2] : memref<168x384xbf16, #tpu.memory_space<vmem>>, vector<128x16xbf16>
    tpu.vector_store %arg6[%c8, %c0_2], %3 {strides = array<i32>} : memref<168x384xbf16, #tpu.memory_space<vmem>>, vector<128x16xbf16>,
    %c0_3 = arith.constant 0 : index
    %c0_4 = arith.constant 0 : index
    %5 = vector.load %arg2[%c0_3, %c0_4] : memref<32x16xbf16, #tpu.memory_space<vmem>>, vector<32x16xbf16>
    %c136 = arith.constant 136 : index
    %c0_5 = arith.constant 0 : index
    %6 = vector.load %arg6[%c136, %c0_5] : memref<168x384xbf16, #tpu.memory_space<vmem>>, vector<32x16xbf16>
    tpu.vector_store %arg6[%c136, %c0_5], %5 {strides = array<i32>} : memref<168x384xbf16, #tpu.memory_space<vmem>>, vector<32x16xbf16>,
    %c0_6 = arith.constant 0 : index
    %c0_7 = arith.constant 0 : index
    %7 = vector.load %arg1[%c0_6, %c0_7] : memref<128x16xbf16, #tpu.memory_space<vmem>>, vector<128x16xbf16>
    %c7 = arith.constant 7 : index
    %c128 = arith.constant 128 : index
    %8 = vector.load %arg6[%c7, %c128] : memref<168x384xbf16, #tpu.memory_space<vmem>>, vector<128x16xbf16>
    tpu.vector_store %arg6[%c7, %c128], %7 {strides = array<i32>} : memref<168x384xbf16, #tpu.memory_space<vmem>>, vector<128x16xbf16>,
    %c0_8 = arith.constant 0 : index
    %c0_9 = arith.constant 0 : index
    %9 = vector.load %arg2[%c0_8, %c0_9] : memref<32x16xbf16, #tpu.memory_space<vmem>>, vector<32x16xbf16>
    %c135 = arith.constant 135 : index
    %c128_10 = arith.constant 128 : index
    %10 = vector.load %arg6[%c135, %c128_10] : memref<168x384xbf16, #tpu.memory_space<vmem>>, vector<32x16xbf16>
    tpu.vector_store %arg6[%c135, %c128_10], %9 {strides = array<i32>} : memref<168x384xbf16, #tpu.memory_space<vmem>>, vector<32x16xbf16>,
    %c0_11 = arith.constant 0 : index
    %c0_12 = arith.constant 0 : index
    %11 = vector.load %arg1[%c0_11, %c0_12] : memref<128x16xbf16, #tpu.memory_space<vmem>>, vector<128x16xbf16>
    %c6 = arith.constant 6 : index
    %c256 = arith.constant 256 : index
    %12 = vector.load %arg6[%c6, %c256] : memref<168x384xbf16, #tpu.memory_space<vmem>>, vector<128x16xbf16>
    tpu.vector_store %arg6[%c6, %c256], %11 {strides = array<i32>} : memref<168x384xbf16, #tpu.memory_space<vmem>>, vector<128x16xbf16>,
    %c0_13 = arith.constant 0 : index
    %c0_14 = arith.constant 0 : index
    %13 = vector.load %arg2[%c0_13, %c0_14] : memref<32x16xbf16, #tpu.memory_space<vmem>>, vector<32x16xbf16>
    %c134 = arith.constant 134 : index
    %c256_15 = arith.constant 256 : index
    %14 = vector.load %arg6[%c134, %c256_15] : memref<168x384xbf16, #tpu.memory_space<vmem>>, vector<32x16xbf16>
    tpu.vector_store %arg6[%c134, %c256_15], %13 {strides = array<i32>} : memref<168x384xbf16, #tpu.memory_space<vmem>>, vector<32x16xbf16>,
    %c8_16 = arith.constant 8 : index
    %c0_17 = arith.constant 0 : index
    %15 = vector.load %arg6[%c8_16, %c0_17] : memref<168x384xbf16, #tpu.memory_space<vmem>>, vector<128x384xbf16>
    %c0_18 = arith.constant 0 : index
    %c0_19 = arith.constant 0 : index
    %c0_20 = arith.constant 0 : index
    %16 = vector.load %arg3[%c0_18, %c0_19, %c0_20] : memref<3x384x32xbf16, #tpu.memory_space<vmem>>, vector<1x384x32xbf16>
    %17 = vector.shape_cast %16 : vector<1x384x32xbf16> to vector<384x32xbf16>
    %cst = arith.constant dense<0.000000e+00> : vector<128x32xf32>
    %18 = tpu.matmul %15, %17, %cst {dimension_numbers = #tpu.dot_dimension_numbers<[1], [0], [0], [1], [0, 0, 1, 1], [], []>} : vector<128x384xbf16>, vector<384x32xbf16>, vector<128x32xf32> -> vector<128x32xf32>
    %c24 = arith.constant 24 : index
    %c0_21 = arith.constant 0 : index
    %19 = vector.load %arg6[%c24, %c0_21] : memref<168x384xbf16, #tpu.memory_space<vmem>>, vector<128x384xbf16>
    %c1 = arith.constant 1 : index
    %c0_22 = arith.constant 0 : index
    %c0_23 = arith.constant 0 : index
    %20 = vector.load %arg3[%c1, %c0_22, %c0_23] : memref<3x384x32xbf16, #tpu.memory_space<vmem>>, vector<1x384x32xbf16>
    %21 = vector.shape_cast %20 : vector<1x384x32xbf16> to vector<384x32xbf16>
    %cst_24 = arith.constant dense<0.000000e+00> : vector<128x32xf32>
    %22 = tpu.matmul %19, %21, %cst_24 {dimension_numbers = #tpu.dot_dimension_numbers<[1], [0], [0], [1], [0, 0, 1, 1], [], []>} : vector<128x384xbf16>, vector<384x32xbf16>, vector<128x32xf32> -> vector<128x32xf32>
    %23 = arith.addf %18, %22 : vector<128x32xf32>
    %c40 = arith.constant 40 : index
    %c0_25 = arith.constant 0 : index
    %24 = vector.load %arg6[%c40, %c0_25] : memref<168x384xbf16, #tpu.memory_space<vmem>>, vector<128x384xbf16>
    %c2 = arith.constant 2 : index
    %c0_26 = arith.constant 0 : index
    %c0_27 = arith.constant 0 : index
    %25 = vector.load %arg3[%c2, %c0_26, %c0_27] : memref<3x384x32xbf16, #tpu.memory_space<vmem>>, vector<1x384x32xbf16>
    %26 = vector.shape_cast %25 : vector<1x384x32xbf16> to vector<384x32xbf16>
    %cst_28 = arith.constant dense<0.000000e+00> : vector<128x32xf32>
    %27 = tpu.matmul %24, %26, %cst_28 {dimension_numbers = #tpu.dot_dimension_numbers<[1], [0], [0], [1], [0, 0, 1, 1], [], []>} : vector<128x384xbf16>, vector<384x32xbf16>, vector<128x32xf32> -> vector<128x32xf32>
    %28 = arith.addf %23, %27 : vector<128x32xf32>
    %c0_29 = arith.constant 0 : index
    %c0_30 = arith.constant 0 : index
    %29 = vector.load %arg4[%c0_29, %c0_30] : memref<1x32xf32, #tpu.memory_space<vmem>>, vector<1x32xf32>
    %30 = vector.broadcast %29 : vector<1x32xf32> to vector<128x32xf32>
    %31 = arith.addf %28, %30 : vector<128x32xf32>
    %cst_31 = arith.constant 0.000000e+00 : f32
    %32 = vector.broadcast %cst_31 : f32 to vector<128x32xf32>
    %33 = arith.maximumf %31, %32 : vector<128x32xf32>
    %34 = arith.truncf %33 : vector<128x32xf32> to vector<128x32xbf16>
    %35 = vector.extract_strided_slice %34 {offsets = [0, 0], sizes = [13, 32], strides = [1, 1]} : vector<128x32xbf16> to vector<13x32xbf16>
    %c0_32 = arith.constant 0 : index
    %c0_33 = arith.constant 0 : index
    %c0_34 = arith.constant 0 : index
    %36 = vector.load %arg5[%c0_32, %c0_33, %c0_34] : memref<8x13x32xbf16, #tpu.memory_space<vmem>>, vector<1x13x32xbf16>
    %37 = vector.shape_cast %36 : vector<1x13x32xbf16> to vector<13x32xbf16>
    %38 = vector.shape_cast %35 : vector<13x32xbf16> to vector<1x13x32xbf16>
    tpu.vector_store %arg5[%c0_32, %c0_33, %c0_34], %38 {strides = array<i32>} : memref<8x13x32xbf16, #tpu.memory_space<vmem>>, vector<1x13x32xbf16>,
    %39 = vector.extract_strided_slice %34 {offsets = [16, 0], sizes = [13, 32], strides = [1, 1]} : vector<128x32xbf16> to vector<13x32xbf16>
    %c1_35 = arith.constant 1 : index
    %c0_36 = arith.constant 0 : index
    %c0_37 = arith.constant 0 : index
    %40 = vector.load %arg5[%c1_35, %c0_36, %c0_37] : memref<8x13x32xbf16, #tpu.memory_space<vmem>>, vector<1x13x32xbf16>
    %41 = vector.shape_cast %40 : vector<1x13x32xbf16> to vector<13x32xbf16>
    %42 = vector.shape_cast %39 : vector<13x32xbf16> to vector<1x13x32xbf16>
    tpu.vector_store %arg5[%c1_35, %c0_36, %c0_37], %42 {strides = array<i32>} : memref<8x13x32xbf16, #tpu.memory_space<vmem>>, vector<1x13x32xbf16>,
    %43 = vector.extract_strided_slice %34 {offsets = [32, 0], sizes = [13, 32], strides = [1, 1]} : vector<128x32xbf16> to vector<13x32xbf16>
    %c2_38 = arith.constant 2 : index
    %c0_39 = arith.constant 0 : index
    %c0_40 = arith.constant 0 : index
    %44 = vector.load %arg5[%c2_38, %c0_39, %c0_40] : memref<8x13x32xbf16, #tpu.memory_space<vmem>>, vector<1x13x32xbf16>
    %45 = vector.shape_cast %44 : vector<1x13x32xbf16> to vector<13x32xbf16>
    %46 = vector.shape_cast %43 : vector<13x32xbf16> to vector<1x13x32xbf16>
    tpu.vector_store %arg5[%c2_38, %c0_39, %c0_40], %46 {strides = array<i32>} : memref<8x13x32xbf16, #tpu.memory_space<vmem>>, vector<1x13x32xbf16>,
    %47 = vector.extract_strided_slice %34 {offsets = [48, 0], sizes = [13, 32], strides = [1, 1]} : vector<128x32xbf16> to vector<13x32xbf16>
    %c3 = arith.constant 3 : index
    %c0_41 = arith.constant 0 : index
    %c0_42 = arith.constant 0 : index
    %48 = vector.load %arg5[%c3, %c0_41, %c0_42] : memref<8x13x32xbf16, #tpu.memory_space<vmem>>, vector<1x13x32xbf16>
    %49 = vector.shape_cast %48 : vector<1x13x32xbf16> to vector<13x32xbf16>
    %50 = vector.shape_cast %47 : vector<13x32xbf16> to vector<1x13x32xbf16>
    tpu.vector_store %arg5[%c3, %c0_41, %c0_42], %50 {strides = array<i32>} : memref<8x13x32xbf16, #tpu.memory_space<vmem>>, vector<1x13x32xbf16>,
    %51 = vector.extract_strided_slice %34 {offsets = [64, 0], sizes = [13, 32], strides = [1, 1]} : vector<128x32xbf16> to vector<13x32xbf16>
    %c4 = arith.constant 4 : index
    %c0_43 = arith.constant 0 : index
    %c0_44 = arith.constant 0 : index
    %52 = vector.load %arg5[%c4, %c0_43, %c0_44] : memref<8x13x32xbf16, #tpu.memory_space<vmem>>, vector<1x13x32xbf16>
    %53 = vector.shape_cast %52 : vector<1x13x32xbf16> to vector<13x32xbf16>
    %54 = vector.shape_cast %51 : vector<13x32xbf16> to vector<1x13x32xbf16>
    tpu.vector_store %arg5[%c4, %c0_43, %c0_44], %54 {strides = array<i32>} : memref<8x13x32xbf16, #tpu.memory_space<vmem>>, vector<1x13x32xbf16>,
    %55 = vector.extract_strided_slice %34 {offsets = [80, 0], sizes = [13, 32], strides = [1, 1]} : vector<128x32xbf16> to vector<13x32xbf16>
    %c5 = arith.constant 5 : index
    %c0_45 = arith.constant 0 : index
    %c0_46 = arith.constant 0 : index
    %56 = vector.load %arg5[%c5, %c0_45, %c0_46] : memref<8x13x32xbf16, #tpu.memory_space<vmem>>, vector<1x13x32xbf16>
    %57 = vector.shape_cast %56 : vector<1x13x32xbf16> to vector<13x32xbf16>
    %58 = vector.shape_cast %55 : vector<13x32xbf16> to vector<1x13x32xbf16>
    tpu.vector_store %arg5[%c5, %c0_45, %c0_46], %58 {strides = array<i32>} : memref<8x13x32xbf16, #tpu.memory_space<vmem>>, vector<1x13x32xbf16>,
    %59 = vector.extract_strided_slice %34 {offsets = [96, 0], sizes = [13, 32], strides = [1, 1]} : vector<128x32xbf16> to vector<13x32xbf16>
    %c6_47 = arith.constant 6 : index
    %c0_48 = arith.constant 0 : index
    %c0_49 = arith.constant 0 : index
    %60 = vector.load %arg5[%c6_47, %c0_48, %c0_49] : memref<8x13x32xbf16, #tpu.memory_space<vmem>>, vector<1x13x32xbf16>
    %61 = vector.shape_cast %60 : vector<1x13x32xbf16> to vector<13x32xbf16>
    %62 = vector.shape_cast %59 : vector<13x32xbf16> to vector<1x13x32xbf16>
    tpu.vector_store %arg5[%c6_47, %c0_48, %c0_49], %62 {strides = array<i32>} : memref<8x13x32xbf16, #tpu.memory_space<vmem>>, vector<1x13x32xbf16>,
    %63 = vector.extract_strided_slice %34 {offsets = [112, 0], sizes = [13, 32], strides = [1, 1]} : vector<128x32xbf16> to vector<13x32xbf16>
    %c7_50 = arith.constant 7 : index
    %c0_51 = arith.constant 0 : index
    %c0_52 = arith.constant 0 : index
    %64 = vector.load %arg5[%c7_50, %c0_51, %c0_52] : memref<8x13x32xbf16, #tpu.memory_space<vmem>>, vector<1x13x32xbf16>
    %65 = vector.shape_cast %64 : vector<1x13x32xbf16> to vector<13x32xbf16>
    %66 = vector.shape_cast %63 : vector<13x32xbf16> to vector<1x13x32xbf16>
    tpu.vector_store %arg5[%c7_50, %c0_51, %c0_52], %66 {strides = array<i32>} : memref<8x13x32xbf16, #tpu.memory_space<vmem>>, vector<1x13x32xbf16>,
    return
  }
  func.func @transform_0(%arg0: i32) -> (i32, i32) {
    %c0_i32 = arith.constant 0 : i32
    %c0_i32_0 = arith.constant 0 : i32
    return %arg0, %c0_i32 : i32, i32
  }
  func.func @transform_1(%arg0: i32) -> (i32, i32) {
    %c1_i32 = arith.constant 1 : i32
    %0 = arith.addi %arg0, %c1_i32 : i32
    %c4_i32 = arith.constant 4 : i32
    %1 = arith.muli %0, %c4_i32 : i32
    %c0_i32 = arith.constant 0 : i32
    %c0_i32_0 = arith.constant 0 : i32
    return %1, %c0_i32 : i32, i32
  }
  func.func @transform_2(%arg0: i32) -> (i32, i32, i32) {
    %c0_i32 = arith.constant 0 : i32
    %c0_i32_0 = arith.constant 0 : i32
    %c0_i32_1 = arith.constant 0 : i32
    %c0_i32_2 = arith.constant 0 : i32
    return %c0_i32, %c0_i32_0, %c0_i32_1 : i32, i32, i32
  }
  func.func @transform_3(%arg0: i32) -> (i32, i32) {
    %c0_i32 = arith.constant 0 : i32
    %c0_i32_0 = arith.constant 0 : i32
    %c0_i32_1 = arith.constant 0 : i32
    return %c0_i32, %c0_i32_0 : i32, i32
  }
  func.func @transform_4(%arg0: i32) -> (i32, i32, i32) {
    %c0_i32 = arith.constant 0 : i32
    %c0_i32_0 = arith.constant 0 : i32
    %c0_i32_1 = arith.constant 0 : i32
    return %arg0, %c0_i32, %c0_i32_0 : i32, i32, i32
  }
}

</mosaic_0001>

<bundles_post_ra>
// kernel: tpu_custom_call.1
= control target key start
LH: loop header
LB: loop body
LE: loop exit
PB: predicated region body
PF: predicated region fallthrough
CT: control target
= control target key end

     0   :  { %9 = vsyncpa [#allocation4], 0  ;;  %s4363_s0 = inlined_call_operand.vmem [shape: bf16[288,16], index: 0, kind: input, shape index: {}]   ;;  %s4364_s1 = inlined_call_operand.vmem [shape: bf16[288,16], index: 1, kind: input, shape index: {}]   ;;  %s4365_s2 = inlined_call_operand.vmem [shape: bf16[3,384,32], index: 2, kind: input, shape index: {}]   ;;  %s4366_s3 = inlined_call_operand.vmem [shape: f32[1,32], index: 3, kind: input, shape index: {}]   ;;  %s4367_s4 = inlined_call_operand.hbm [shape: bf16[13,13,32], index: 4, kind: output, shape index: {}]  }
   0x1   :  { %11 = vsyncpa [#allocation4 + $0x1], 0  ;;  %s3528_s15 = smov 0   ;;  %s3530_s16 = smov 0  }
   0x2   :  { %s3532_s17 = smov 0   ;;  %s3534_s18 = smov 0  }
   0x3 LB: > { %s3549_s19 = sadd.s32 4294967295, %s3497_s18   ;;  %s2532_s20 = sadd.s32 4294967294, %s3497_s18   ;;  %s3497_s18 = sphi %s3534_s18, %s4383_s18   ;;  %s3493_s17 = sphi %s3532_s17, %s4382_s17   ;;  %s3489_s16 = sphi %s3530_s16, %s4381_s16   ;;  %s3485_s15 = sphi %s3528_s15, %s4380_s15  }
   0x4   : > { %s3553_s21 = sadd.s32 1, %s3497_s18   ;;  %s122_s22 = sadd.s32 1, %s3493_s17 }
   0x5   : > { %s119_s23 = ssub.s32 %s3497_s18, %s3553_s21  ;;  %p132_p0 = scmp.ne.s32.totalorder %s3493_s17, %s3489_s16 }
   0x6   : > { %p120_p1 = scmp.eq.s32.totalorder %s119_s23, 0  ;;  %p133_p2 = scmp.eq.s32.totalorder %s3549_s19, 1 }
   0x7   : > { %p138_p3 = scmp.ne.s32.totalorder %s3489_s16, %s3485_s15  ;;  %p139_p4 = scmp.eq.s32.totalorder %s2532_s20, 1 }
   0x8   : > { %s3564_s24 = scalar_select %p120_p1, %s3493_s17, %s122_s22  }
   0x9   : > { %p3566_p5 = por %p133_p2, %p132_p0  ;;  %p3570_p6 = por %p139_p4, %p138_p3 }
   0xa   : > { %p2537_p7 = scmp.ge.s32.totalorder %s3497_s18, 1  ;;  %p193_p8 = scmp.lt.s32.totalorder %s3497_s18, 3 }
   0xc   : > { %p194_p9 = pnand %p2537_p7, %p193_p8 }
   0xd   : > { %s227_s27 = sand.u32 (!%p194_p9), 1, %s3489_s16   ;;  %s2539_s28 = sshll.u32 (!%p194_p9), %s3549_s19, 4 }
   0xe   : > { %197 = sbr.rel (%p194_p9) target bundleno = 484 (0x1e4), region = 36  ;;  %s2538_s29 = sshll.u32 (!%p194_p9), %s227_s27, 6 }
   0xf   : > { %p235_p10 = scmp.lt.s32.totalorder (!%p194_p9), %s2539_s28, 35  ;;  %s2843_s30 = sadd.s32 (!%p194_p9), 16, %s2539_s28 }
  0x10   : > { %p247_p11 = scmp.lt.s32.totalorder (!%p194_p9), %s2843_s30, 35  ;;  %s3590_s13 = scalar_lea.vmem (!%p194_p9), [#allocation3], %s2538_s29 }
  0x11   : > { %p2544_p12 = scmp.ne.s32.totalorder (!%p194_p9), %s3549_s19, 0 }
  0x15   : > { %s4385_s28 = smov (!%p235_p10, %s2539_s28), 35  ;;  %s4387_s30 = smov (!%p247_p11, %s2843_s30), 35 }
  0x16   : > { %s2540_s5 = sshll.u32 %s4385_s28, 2  ;;  %s2543_s9 = sshll.u32 %s4387_s30, 2  ;;  %v3499_v0 = vmov (!%p2544_p12), 0  }
  0x17   : > { %s3583_s8 = scalar_lea.vmem %s4363_s0, %s2540_s5  ;;  %s3588_s12 = scalar_lea.vmem %s4364_s1, %s2543_s9  ;;  %265 = vst [vmem:[#allocation2] sm:$0xff] (!%p2544_p12), %v3499_v0  ;;  %267 = vst [vmem:[#allocation2 + $0xc] sm:$0xff] (!%p2544_p12), %v3499_v0 }
  0x18   : > { %264 = sbr.rel (%p2544_p12) target bundleno = 44 (0x2c), region = 40  ;;  %268 = vst [vmem:[#allocation2 + $0x14] sm:$0xf] (!%p2544_p12), %v3499_v0  ;;  %269 = vst [vmem:[#allocation2 + $0x18] sm:$0xff] (!%p2544_p12), %v3499_v0 }
  0x19   : > { %270 = vst [vmem:[#allocation2 + $0x20] sm:$0xf] (!%p2544_p12), %v3499_v0  ;;  %271 = vst [vmem:[#allocation2 + $0x24] sm:$0xff] (!%p2544_p12), %v3499_v0 }
  0x1a   : > { %272 = vst [vmem:[#allocation2 + $0x2c] sm:$0xf] (!%p2544_p12), %v3499_v0  ;;  %273 = vst [vmem:[#allocation2 + $0x30] sm:$0xff] (!%p2544_p12), %v3499_v0 }
  0x1b   : > { %274 = vst [vmem:[#allocation2 + $0x38] sm:$0xf] (!%p2544_p12), %v3499_v0  ;;  %275 = vst [vmem:[#allocation2 + $0x3c] sm:$0xff] (!%p2544_p12), %v3499_v0 }
  0x1c   : > { %276 = vst [vmem:[#allocation2 + $0x44] sm:$0xf] (!%p2544_p12), %v3499_v0  ;;  %277 = vst [vmem:[#allocation2 + $0x48] sm:$0xff] (!%p2544_p12), %v3499_v0 }
  0x1d   : > { %278 = vst [vmem:[#allocation2 + $0x50] sm:$0xf] (!%p2544_p12), %v3499_v0  ;;  %279 = vst [vmem:[#allocation2 + $0x54] sm:$0xff] (!%p2544_p12), %v3499_v0 }
  0x1e   : > { %280 = vst [vmem:[#allocation2 + $0x5c] sm:$0xf] (!%p2544_p12), %v3499_v0  ;;  %281 = vst [vmem:[#allocation2 + $0x60] sm:$0xff] (!%p2544_p12), %v3499_v0 }
  0x1f   : > { %282 = vst [vmem:[#allocation2 + $0x68] sm:$0xf] %v3499_v0  ;;  %283 = vst [vmem:[#allocation2 + $0x6c] sm:$0xff] %v3499_v0 }
  0x20   : > { %284 = vst [vmem:[#allocation2 + $0x74] sm:$0xf] %v3499_v0  ;;  %285 = vst [vmem:[#allocation2 + $0x78] sm:$0xff] %v3499_v0 }
  0x21   : > { %286 = vst [vmem:[#allocation2 + $0x80] sm:$0xf] %v3499_v0  ;;  %287 = vst [vmem:[#allocation2 + $0x84] sm:$0xff] %v3499_v0 }
  0x22   : > { %288 = vst [vmem:[#allocation2 + $0x8c] sm:$0xf] %v3499_v0  ;;  %289 = vst [vmem:[#allocation2 + $0x90] sm:$0xff] %v3499_v0 }
  0x23   : > { %290 = vst [vmem:[#allocation2 + $0x98] sm:$0xf] %v3499_v0  ;;  %291 = vst [vmem:[#allocation2 + $0x9c] sm:$0xff] %v3499_v0 }
  0x24   : > { %292 = vst [vmem:[#allocation2 + $0xa4] sm:$0xf] %v3499_v0  ;;  %293 = vst [vmem:[#allocation2 + $0xa8] sm:$0xff] %v3499_v0 }
  0x25   : > { %294 = vst [vmem:[#allocation2 + $0xb0] sm:$0xf] %v3499_v0  ;;  %295 = vst [vmem:[#allocation2 + $0xb4] sm:$0xff] %v3499_v0 }
  0x26   : > { %296 = vst [vmem:[#allocation2 + $0xbc] sm:$0xf] %v3499_v0  ;;  %297 = vst [vmem:[#allocation2 + $0xc0] sm:$0xff] %v3499_v0 }
  0x27   : > { %298 = vst [vmem:[#allocation2 + $0xc8] sm:$0xf] %v3499_v0  ;;  %299 = vst [vmem:[#allocation2 + $0xcc] sm:$0xff] %v3499_v0 }
  0x28   : > { %300 = vst [vmem:[#allocation2 + $0xd4] sm:$0xf] %v3499_v0  ;;  %301 = vst [vmem:[#allocation2 + $0xd8] sm:$0xff] %v3499_v0 }
  0x29   : > { %302 = vst [vmem:[#allocation2 + $0xe0] sm:$0xf] %v3499_v0  ;;  %303 = vst [vmem:[#allocation2 + $0xe4] sm:$0xff] %v3499_v0 }
  0x2a   : > { %304 = vst [vmem:[#allocation2 + $0xec] sm:$0xf] %v3499_v0  ;;  %305 = vst [vmem:[#allocation2 + $0xf0] sm:$0xff] %v3499_v0 }
  0x2b   : > { %306 = vst [vmem:[#allocation2 + $0xf8] sm:$0xf] %v3499_v0 }
  0x2c PF: > { %v3317_v1 = vld [vmem:[%s4365_s2 + $0x100] sm:$0xff]   ;;  %v3320_v4 = vld [vmem:[%s4365_s2 + $0x108] sm:$0xff]   ;;  %v3323_v7 = vld [vmem:[%s4365_s2 + $0x110] sm:$0xff]   ;;  %vm323_vm0 = vcmask 125952   ;;  %vm658_vm1 = vcmask 1042432   ;;  %vm659_vm2 = vcmask 1046532  }
  0x2d   : > { %v3318_v2 = vld [vmem:[%s4365_s2 + $0x140] sm:$0xff]   ;;  %2844 = vmatprep.subr.bf16.mxu0 %v3317_v1  ;;  %v3321_v5 = vld [vmem:[%s4365_s2 + $0x148] sm:$0xff]   ;;  %v3324_v8 = vld [vmem:[%s4365_s2 + $0x150] sm:$0xff]   ;;  %vm364_vm3 = vsmask.f32 3328  ;;  %vm543_vm7 = vcmask 125955  }
  0x2e   : > { %v3319_v3 = vld [vmem:[%s4365_s2 + $0xc0] sm:$0xff]   ;;  %3084 = vmatprep.subr.bf16.mxu1 %v3318_v2  ;;  %v3322_v6 = vld [vmem:[%s4365_s2 + $0xc8] sm:$0xff]   ;;  %v3325_v9 = vld [vmem:[%s4365_s2 + $0xd0] sm:$0xff]   ;;  %vm365_vm4 = vsmask.f32 7440  ;;  %vm742_vm8 = vcmask 124928  }
  0x2f   : > { %2845 = vmatpush3.bf16.msra.mxu0 %v3319_v3  ;;  %3085 = vmatpush3.bf16.msra.mxu1 %v3318_v2  ;;  %v3326_v10 = vld [vmem:[%s4365_s2 + $0x118] sm:$0xff]   ;;  %v3329_v13 = vld [vmem:[%s4365_s2 + $0x120] sm:$0xff]   ;;  %v3332_v16 = vld [vmem:[%s4365_s2 + $0x128] sm:$0xff]   ;;  %vm544_vm9 = vsmask.f32 7950  ;;  %vm2343_vm12 = vcmask 257024  }
  0x30   : > { %2846 = vmatprep.subr.bf16.mxu0 %v3320_v4  ;;  %3086 = vmatprep.subr.bf16.mxu1 %v3321_v5  ;;  %v3327_v11 = vld [vmem:[%s4365_s2 + $0x158] sm:$0xff]   ;;  %v3330_v14 = vld [vmem:[%s4365_s2 + $0x160] sm:$0xff]   ;;  %v3333_v17 = vld [vmem:[%s4365_s2 + $0x168] sm:$0xff]   ;;  %vm2345_vm13 = vcmask 256000   ;;  %vm2346_vm14 = vsmask.f32 2304 }
  0x31   : > { %v3328_v12 = vld [vmem:[%s4365_s2 + $0xd8] sm:$0xff]   ;;  %v3331_v15 = vld [vmem:[%s4365_s2 + $0xe0] sm:$0xff]   ;;  %v3334_v18 = vld [vmem:[%s4365_s2 + $0xe8] sm:$0xff]   ;;  %s4302_s14 = scalar_lea.sflag [#allocation4], %s227_s27 }
  0x32   : > { %v3335_v19 = vld [vmem:[%s4365_s2 + $0x130] sm:$0xff]   ;;  %v3338_v22 = vld [vmem:[%s4365_s2 + $0x138] sm:$0xff]   ;;  %v309_v24 = vld [vmem:[%s3583_s8 + $0x8] sm:$0xf] }
  0x33   : > { %2847 = vmatpush3.bf16.msra.mxu0 %v3322_v6  ;;  %3087 = vmatpush3.bf16.msra.mxu1 %v3321_v5  ;;  %v3336_v20 = vld [vmem:[%s4365_s2 + $0x170] sm:$0xff]   ;;  %v3339_v23 = vld [vmem:[%s4365_s2 + $0x178] sm:$0xff]   ;;  %v310_v25 = vld [vmem:[%s3583_s8 + $0xc] sm:$0xf]  ;;  %326 = vst.msk [vmem:[#allocation2 + $0x24] sm:$0xf] %vm323_vm0, %v309_v24 }
  0x34   : > { %2848 = vmatprep.subr.bf16.mxu0 %v3323_v7  ;;  %3088 = vmatprep.subr.bf16.mxu1 %v3324_v8  ;;  %v3337_v21 = vld [vmem:[%s4365_s2 + $0xf0] sm:$0xff]   ;;  %v350_v26 = vld [vmem:[%s3583_s8 + $0x8] sm:$0xf]  ;;  %327 = vst.msk [vmem:[#allocation2 + $0x30] sm:$0xf] %vm323_vm0, %v310_v25  ;;  %v3340_v29 = vld [vmem:[%s4365_s2 + $0xf8] sm:$0xff]  }
  0x35   : > { %v351_v27 = vld [vmem:[%s3583_s8 + $0xc] sm:$0xf]  ;;  %v352_v28 = vld [vmem:[%s3583_s8 + $0x10] sm:$0xf]  ;;  %v387_v30 = vshll.u32 %v350_v26, 16  ;;  %v391_v31 = vshrl.u32 %v350_v26, 16  ;;  %vm3688_vm5 = vmor %vm658_vm1, %vm659_vm2 }
  0x36   : > { %v397_v32 = vshll.u32 %v351_v27, 16  ;;  %v401_v33 = vshrl.u32 %v351_v27, 16  ;;  %v407_v34 = vshll.u32 %v352_v28, 16  ;;  %v411_v35 = vshrl.u32 %v352_v28, 16  ;;  %v3673_v36 = vld [vmem:[%s3583_s8 + $0x8] sm:$0xf]  ;;  %vm3699_vm6 = vmor %vm364_vm3, %vm365_vm4 }
  0x37   : > { %2849 = vmatpush3.bf16.msra.mxu0 %v3325_v9  ;;  %3089 = vmatpush3.bf16.msra.mxu1 %v3324_v8  ;;  %v3346_v37 = vld [vmem:[%s4365_s2 + $0x40] sm:$0xff]   ;;  %v3681_v39 = vrot.slane %v387_v30, 5  ;;  %v393_v40 = vrot.slane %v391_v31, 4  ;;  %v629_v42 = vld [vmem:[%s3583_s8 + $0xc] sm:$0xf]  ;;  %v666_v43 = vrot.slane %v3673_v36, 5  ;;  %vm3853_vm10 = vmand %vm543_vm7, %vm544_vm9 }
  0x38   : > { %2850 = vmatprep.subr.bf16.mxu0 %v3326_v10  ;;  %3090 = vmatprep.subr.bf16.mxu1 %v3327_v11  ;;  %v3347_v38 = vld [vmem:[%s4365_s2 + $0x1c0] sm:$0xff]   ;;  %v399_v41 = vrot.slane %v397_v32, 5  ;;  %v403_v44 = vrot.slane %v401_v33, 4  ;;  %v409_v45 = vrot.slane %v407_v34, 5  ;;  %v413_v46 = vrot.slane %v411_v35, 4  ;;  %v3350_v27 = vld [vmem:[%s4365_s2 + $0x48] sm:$0xff]   ;;  %vm3990_vm11 = vmand %vm323_vm0, %vm364_vm3 }
  0x39   : > { %v630_v47 = vld [vmem:[%s3583_s8 + $0x10] sm:$0xf]  ;;  %v669_v49 = vrot.slane %v629_v42, 5  ;;  %v394_v50 = vor.u32 %v393_v40, %v3681_v39  ;;  %v668_v51 = vrot.slane %v666_v43, 4  ;;  %v631_v53 = vld [vmem:[%s3583_s8 + $0x14] sm:$0xf]  ;;  %vm4233_vm15 = vmand %vm2345_vm13, %vm2346_vm14 }
  0x3a   : > { %v672_v52 = vrot.slane %v630_v47, 5  ;;  %v632_v54 = vld [vmem:[%s3583_s8 + $0x18] sm:$0xf]  ;;  %v404_v56 = vor.u32 %v403_v44, %v399_v41  ;;  %v675_v58 = vrot.slane %v631_v53, 5  ;;  %v414_v0 = vor.u32 %v413_v46, %v409_v45  ;;  %v311_v7 = vld [vmem:[%s3583_s8 + $0x10] sm:$0xf] }
  0x3b   : > { %2851 = vmatpush3.bf16.msra.mxu0 %v3328_v12  ;;  %3091 = vmatpush3.bf16.msra.mxu1 %v3327_v11  ;;  %v671_v57 = vrot.slane %v669_v49, 4  ;;  %v395_v59 = vrot.slane %v394_v50, 4  ;;  %v670_v60 = vsel %vm3688_vm5, %v668_v51, %v669_v49  ;;  %v678_v62 = vrot.slane %v632_v54, 5  ;;  %v312_v8 = vld [vmem:[%s3583_s8 + $0x14] sm:$0xf]  ;;  %v3349_v24 = vld [vmem:[%s4365_s2 + $0x180] sm:$0xff]  }
  0x3c   : > { %2852 = vmatprep.subr.bf16.mxu0 %v3329_v13  ;;  %3092 = vmatprep.subr.bf16.mxu1 %v3330_v14  ;;  %v674_v61 = vrot.slane %v672_v52, 4  ;;  %v405_v63 = vrot.slane %v404_v56, 4  ;;  %729 = vst.msk [vmem:[#allocation2 + $0x2c] sm:$0xf] %vm323_vm0, %v670_v60  ;;  %v677_v2 = vrot.slane %v675_v58, 4  ;;  %v415_v9 = vrot.slane %v414_v0, 4 }
  0x3d   : > { %v673_v1 = vsel %vm3688_vm5, %v671_v57, %v672_v52  ;;  %v400_v3 = vsel %vm3699_vm6, %v395_v59, %v399_v41  ;;  %v680_v10 = vrot.slane %v678_v62, 4  ;;  %328 = vst.msk [vmem:[#allocation2 + $0x3c] sm:$0xf] %vm323_vm0, %v311_v7  ;;  %329 = vst.msk [vmem:[#allocation2 + $0x48] sm:$0xf] %vm323_vm0, %v312_v8  ;;  %v3351_v42 = vld [vmem:[%s4365_s2 + $0x8] sm:$0xff]  }
  0x3e   : > { %730 = vst.msk [vmem:[#allocation2 + $0x38] sm:$0xf] %vm323_vm0, %v673_v1  ;;  %v676_v4 = vsel %vm3688_vm5, %v674_v61, %v675_v58  ;;  %v410_v5 = vsel %vm3699_vm6, %v405_v63, %v409_v45  ;;  %551 = vst.msk [vmem:[#allocation2 + $0x28] sm:$0xf] %vm323_vm0, %v400_v3  ;;  %v679_v6 = vsel %vm3688_vm5, %v677_v2, %v678_v62  ;;  %v353_v11 = vld [vmem:[%s3583_s8 + $0x14] sm:$0xf] }
  0x3f   : > { %2853 = vmatpush3.bf16.msra.mxu0 %v3331_v15  ;;  %3093 = vmatpush3.bf16.msra.mxu1 %v3330_v14  ;;  %731 = vst.msk [vmem:[#allocation2 + $0x44] sm:$0xf] %vm323_vm0, %v676_v4  ;;  %552 = vst.msk [vmem:[#allocation2 + $0x34] sm:$0xf] %vm323_vm0, %v410_v5  ;;  %v354_v12 = vld [vmem:[%s3583_s8 + $0x18] sm:$0xf] }
  0x40   : > { %2854 = vmatprep.subr.bf16.mxu0 %v3332_v16  ;;  %3094 = vmatprep.subr.bf16.mxu1 %v3333_v17  ;;  %732 = vst.msk [vmem:[#allocation2 + $0x50] sm:$0xf] %vm323_vm0, %v679_v6  ;;  %v633_v13 = vld [vmem:[%s3583_s8 + $0x1c] sm:$0xf]  ;;  %v417_v14 = vshll.u32 %v353_v11, 16  ;;  %v421_v15 = vshrl.u32 %v353_v11, 16 }
  0x41   : > { %v427_v16 = vshll.u32 %v354_v12, 16  ;;  %v3741_v32 = vld [vmem:[#allocation2 + $0x24] ss:$12 sps:$4 sm:$0xff]   ;;  %v636_v41 = vld [vmem:[%s3583_s8 + $0x28] sm:$0xf]  ;;  %v3360_v59 = vld [vmem:[%s4365_s2 + $0x58] sm:$0xff]  }
  0x42   : > { %v419_v25 = vrot.slane %v417_v14, 5  ;;  %v423_v26 = vrot.slane %v421_v15, 4  ;;  %v690_v47 = vrot.slane %v636_v41, 5  ;;  %v3357_v51 = vld [vmem:[%s4365_s2 + $0x1c8] sm:$0xff]   ;;  %v3356_v53 = vld [vmem:[%s4365_s2 + $0x50] sm:$0xff]   ;;  %v3361_v0 = vld [vmem:[%s4365_s2 + $0x18] sm:$0xff]  }
  0x43   : > { %2855 = vmatpush3.bf16.msra.mxu0 %v3334_v18  ;;  %3095 = vmatpush3.bf16.msra.mxu1 %v3333_v17  ;;  %v431_v17 = vshrl.u32 %v354_v12, 16  ;;  %v634_v18 = vld [vmem:[%s3583_s8 + $0x20] sm:$0xf]  ;;  %v429_v28 = vrot.slane %v427_v16, 5  ;;  %v3359_v54 = vld [vmem:[%s4365_s2 + $0x188] sm:$0xff]   ;;  %v3358_v57 = vld [vmem:[%s4365_s2 + $0x10] sm:$0xff]  }
  0x44   : > { %2856 = vmatprep.subr.bf16.mxu0 %v3335_v19  ;;  %3096 = vmatprep.subr.bf16.mxu1 %v3336_v20  ;;  %v681_v19 = vrot.slane %v633_v13, 5  ;;  %v420_v34 = vsel %vm3699_vm6, %v415_v9, %v419_v25  ;;  %v424_v35 = vor.u32 %v423_v26, %v419_v25  ;;  %v692_v61 = vrot.slane %v690_v47, 4  ;;  %v313_v63 = vld [vmem:[%s3583_s8 + $0x18] sm:$0xf]  ;;  %v314_v1 = vld [vmem:[%s3583_s8 + $0x1c] sm:$0xf] }
  0x45   : > { %553 = vst.msk [vmem:[#allocation2 + $0x40] sm:$0xf] %vm323_vm0, %v420_v34  ;;  %v433_v52 = vrot.slane %v431_v17, 4  ;;  %330 = vst.msk [vmem:[#allocation2 + $0x54] sm:$0xf] %vm323_vm0, %v313_v63  ;;  %v3366_v15 = vld [vmem:[%s4365_s2 + $0x60] sm:$0xff]  }
  0x46   : > { %v683_v30 = vrot.slane %v681_v19, 4  ;;  %v3743_v33 = vld [vmem:[#allocation2 + $0x28] ss:$12 sps:$4 sm:$0xff]   ;;  %v425_v44 = vrot.slane %v424_v35, 4  ;;  %v355_v2 = vld [vmem:[%s3583_s8 + $0x1c] sm:$0xf] }
  0x47   : > { %2857 = vmatpush3.bf16.msra.mxu0 %v3337_v21  ;;  %3097 = vmatpush3.bf16.msra.mxu1 %v3336_v20  ;;  %v684_v20 = vrot.slane %v634_v18, 5  ;;  %v635_v21 = vld [vmem:[%s3583_s8 + $0x24] sm:$0xf]  ;;  %v434_v56 = vor.u32 %v433_v52, %v429_v28  ;;  %331 = vst.msk [vmem:[#allocation2 + $0x60] sm:$0xf] %vm323_vm0, %v314_v1  ;;  %v437_v4 = vshll.u32 %v355_v2, 16 }
  0x48   : > { %2858 = vmatprep.subr.bf16.mxu0 %v3338_v22  ;;  %3098 = vmatprep.subr.bf16.mxu1 %v3339_v23  ;;  %v3344_v22 = vld [vmem:[#allocation2 + $0x2c] ss:$12 sps:$4 sm:$0xff]   ;;  %v430_v49 = vsel %vm3699_vm6, %v425_v44, %v429_v28  ;;  %v356_v3 = vld [vmem:[%s3583_s8 + $0x20] sm:$0xf]  ;;  %v441_v5 = vshrl.u32 %v355_v2, 16  ;;  %v3413_v48 = vld [vmem:[%s4365_s2 + $0x210] sm:$0xff]  }
  0x49   : > { %v686_v31 = vrot.slane %v684_v20, 4  ;;  %3100 = vmatprep.mubr.bf16.mxu1 %v3344_v22  ;;  %v685_v40 = vsel %vm3688_vm5, %v683_v30, %v684_v20  ;;  %1210 = vmatprep.mubr.bf16.mxu0 %v3743_v33  ;;  %554 = vst.msk [vmem:[#allocation2 + $0x4c] sm:$0xf] %vm323_vm0, %v430_v49  ;;  %v435_v60 = vrot.slane %v434_v56, 4  ;;  %v637_v6 = vld [vmem:[%s3583_s8 + $0x2c] sm:$0xf] }
  0x4a   : > { %734 = vst.msk [vmem:[#allocation2 + $0x68] sm:$0xf] %vm323_vm0, %v685_v40  ;;  %v447_v9 = vshll.u32 %v356_v3, 16  ;;  %v439_v12 = vrot.slane %v437_v4, 5  ;;  %v443_v13 = vrot.slane %v441_v5, 4  ;;  %v451_v14 = vshrl.u32 %v356_v3, 16 }
  0x4b   : > { %2859 = vmatpush3.bf16.msra.mxu0 %v3340_v29  ;;  %3099 = vmatpush3.bf16.msra.mxu1 %v3339_v23  ;;  %v3348_v23 = vld [vmem:[%s4365_s2] sm:$0xff]   ;;  %v682_v29 = vsel %vm3688_vm5, %v680_v10, %v681_v19  ;;  %v638_v17 = vld [vmem:[%s3583_s8 + $0x30] sm:$0xf]  ;;  %v693_v18 = vrot.slane %v637_v6, 5  ;;  %v639_v19 = vld [vmem:[%s3583_s8 + $0x34] sm:$0xf] }
  0x4c   : > { %2924 = vmatprep.subr.bf16.mxu1 %v3346_v37  ;;  %3004 = vmatprep.subr.bf16.mxu0 %v3347_v38  ;;  %733 = vst.msk [vmem:[#allocation2 + $0x5c] sm:$0xf] %vm323_vm0, %v682_v29  ;;  %v687_v37 = vrot.slane %v635_v21, 5  ;;  %v3345_v38 = vld [vmem:[#allocation2 + $0x44] ss:$12 sps:$4 sm:$0xff]   ;;  %v781_v58 = vld [vmem:[#allocation2 + $0x3c] sm:$0xff]  ;;  %v440_v20 = vsel %vm3699_vm6, %v435_v60, %v439_v12  ;;  %v444_v21 = vor.u32 %v443_v13, %v439_v12 }
  0x4d   : > { %v449_v16 = vrot.slane %v447_v9, 5  ;;  %v696_v22 = vrot.slane %v638_v17, 5  ;;  %555 = vst.msk [vmem:[#allocation2 + $0x58] sm:$0xf] %vm323_vm0, %v440_v20  ;;  %v694_v25 = vsel %vm3688_vm5, %v692_v61, %v693_v18  ;;  %v695_v26 = vrot.slane %v693_v18, 4  ;;  %v3368_v35 = vld [vmem:[%s4365_s2 + $0x20] sm:$0xff]  }
  0x4e   : > { %v688_v45 = vsel %vm3688_vm5, %v686_v31, %v687_v37  ;;  %v689_v46 = vrot.slane %v687_v37, 4  ;;  %1211 = vmatmul.mubr.bf16.vlgmr.msra.gmra.mrb[0].mxu0 %v3741_v32  ;;  %3101 = vmatmul.mubr.bf16.vlgmr.msra.gmra.mrb[0].mxu1 %v3345_v38  ;;  %v445_v28 = vrot.slane %v444_v21, 4  ;;  %737 = vst.msk [vmem:[#allocation2 + $0x8c] sm:$0xf] %vm323_vm0, %v694_v25  ;;  %v3367_v31 = vld [vmem:[%s4365_s2 + $0x1d0] sm:$0xff]   ;;  %v453_v37 = vrot.slane %v451_v14, 4 }
  0x4f   : > { %735 = vst.msk [vmem:[#allocation2 + $0x74] sm:$0xf] %vm323_vm0, %v688_v45  ;;  %2925 = vmatpush3.bf16.msra.mxu1 %v3348_v23  ;;  %3005 = vmatpush3.bf16.msra.mxu0 %v3349_v24  ;;  %v640_v23 = vld [vmem:[%s3583_s8 + $0x38] sm:$0xf]  ;;  %v699_v24 = vrot.slane %v639_v19, 5  ;;  %v698_v29 = vrot.slane %v696_v22, 4  ;;  %v697_v34 = vsel %vm3688_vm5, %v695_v26, %v696_v22 }
  0x50   : > { %v691_v50 = vsel %vm3688_vm5, %v689_v46, %v690_v47  ;;  %2926 = vmatprep.subr.bf16.mxu1 %v3350_v27  ;;  %3006 = vmatprep.subr.bf16.mxu0 %v3357_v51  ;;  %v783_v7 = vld [vmem:[#allocation2 + $0x48] sm:$0xff]  ;;  %v702_v27 = vrot.slane %v640_v23, 5  ;;  %v450_v38 = vsel %vm3699_vm6, %v445_v28, %v449_v16  ;;  %738 = vst.msk [vmem:[#allocation2 + $0x98] sm:$0xf] %vm323_vm0, %v697_v34  ;;  %v315_v49 = vld [vmem:[%s3583_s8 + $0x20] sm:$0xf] }
  0x51   : > { %736 = vst.msk [vmem:[#allocation2 + $0x80] sm:$0xf] %vm323_vm0, %v691_v50  ;;  %v3792_v8 = vld [vmem:[#allocation2 + $0x40] ss:$12 sps:$4 sm:$0xff]   ;;  %v3794_v10 = vcombine.low %v781_v58, %v783_v7  ;;  %v701_v30 = vrot.slane %v699_v24, 4  ;;  %v700_v40 = vsel %vm3688_vm5, %v698_v29, %v699_v24  ;;  %v454_v45 = vor.u32 %v453_v37, %v449_v16  ;;  %v3377_v20 = vld [vmem:[%s4365_s2 + $0x1d8] sm:$0xff]  }
  0x52   : > { %1218 = vmatprep.mubr.bf16.mxu0 %v3792_v8  ;;  %556 = vst.msk [vmem:[#allocation2 + $0x64] sm:$0xf] %vm323_vm0, %v450_v38  ;;  %739 = vst.msk [vmem:[#allocation2 + $0xa4] sm:$0xf] %vm323_vm0, %v700_v40  ;;  %v3370_v44 = vld [vmem:[%s4365_s2 + $0x68] sm:$0xff]   ;;  %v704_v47 = vrot.slane %v702_v27, 4 }
  0x53   : > { %2927 = vmatpush3.bf16.msra.mxu1 %v3351_v42  ;;  %3007 = vmatpush3.bf16.msra.mxu0 %v3359_v54  ;;  %v3354_v62 = vld [vmem:[#allocation2 + $0x5c] ss:$12 sps:$4 sm:$0xff]   ;;  %v703_v41 = vsel %vm3688_vm5, %v701_v30, %v702_v27  ;;  %v3369_v42 = vld [vmem:[%s4365_s2 + $0x190] sm:$0xff]   ;;  %v316_v50 = vld [vmem:[%s3583_s8 + $0x24] sm:$0xf]  ;;  %v455_v54 = vrot.slane %v454_v45, 4 }
  0x54   : > { %2928 = vmatprep.subr.bf16.mxu1 %v3356_v53  ;;  %3104 = vmatprep.mubr.bf16.mxu1 %v3354_v62  ;;  %740 = vst.msk [vmem:[#allocation2 + $0xb0] sm:$0xf] %vm323_vm0, %v703_v41  ;;  %v3371_v46 = vld [vmem:[%s4365_s2 + $0x28] sm:$0xff]   ;;  %v357_v51 = vld [vmem:[%s3583_s8 + $0x24] sm:$0xf]  ;;  %v785_v52 = vld [vmem:[#allocation2 + $0x54] sm:$0xff] }
  0x55   : > { %3008 = vmatprep.subr.bf16.mxu0 %v3367_v31  ;;  %332 = vst.msk [vmem:[#allocation2 + $0x6c] sm:$0xf] %vm323_vm0, %v315_v49  ;;  %333 = vst.msk [vmem:[#allocation2 + $0x78] sm:$0xf] %vm323_vm0, %v316_v50  ;;  %v358_v53 = vld [vmem:[%s3583_s8 + $0x28] sm:$0xf] }
  0x56   : > { %1219 = vmatmul.mubr.bf16.gmra.mrb[4].mxu0 %v3794_v10  ;;  %v457_v56 = vshll.u32 %v357_v51, 16  ;;  %v467_v58 = vshll.u32 %v358_v53, 16  ;;  %v348_v60 = vld [vmem:[%s3583_s8] sm:$0xf]  ;;  %v641_v19 = vld [vmem:[%s3583_s8 + $0x3c] sm:$0xf] }
  0x57   : > { %2929 = vmatpush3.bf16.msra.mxu1 %v3358_v57  ;;  %3009 = vmatpush3.bf16.msra.mxu0 %v3369_v42  ;;  %v461_v57 = vshrl.u32 %v357_v51, 16  ;;  %v368_v63 = vshll.u32 %v348_v60, 16  ;;  %v3850_v1 = vld [vmem:[#allocation2 + $0x8c] ss:$12 sps:$4 sm:$0xff]   ;;  %v3874_v18 = vld [vmem:[%s3583_s8] sm:$0xf] }
  0x58   : > { %v3796_v11 = vld [vmem:[#allocation2 + $0x74] ss:$12 sps:$4 sm:$0xff]   ;;  %2930 = vmatprep.subr.bf16.mxu1 %v3360_v59  ;;  %v471_v59 = vshrl.u32 %v358_v53, 16  ;;  %v459_v61 = vrot.slane %v457_v56, 5  ;;  %v469_v2 = vrot.slane %v467_v58, 5  ;;  %v661_v21 = vrot.slane %v3874_v18, 5  ;;  %3010 = vmatprep.subr.bf16.mxu0 %v3377_v20 }
  0x59   : > { %3105 = vmatmul.mubr.bf16.gmra.mrb[4].mxu1 %v3796_v11  ;;  %v463_v62 = vrot.slane %v461_v57, 4  ;;  %v787_v5 = vld [vmem:[#allocation2 + $0x60] sm:$0xff]  ;;  %v3861_v12 = vrot.slane %v368_v63, 5  ;;  %v705_v22 = vrot.slane %v641_v19, 5  ;;  %v3888_v27 = vld [vmem:[%s3588_s12 + $0x8] sm:$0xf] }
  0x5a   : > { %v473_v4 = vrot.slane %v471_v59, 4  ;;  %v3857_v6 = vld [vmem:[#allocation2 + $0x58] ss:$12 sps:$4 sm:$0xff]   ;;  %v460_v7 = vsel %vm3699_vm6, %v455_v54, %v459_v61  ;;  %3108 = vmatprep.mubr.bf16.mxu1 %v3850_v1  ;;  %v3864_v13 = vcombine.low %v785_v52, %v787_v5  ;;  %v744_v23 = vld [vmem:[%s3588_s12] sm:$0xf]  ;;  %v757_v31 = vrot.slane %v3888_v27, 5 }
  0x5b   : > { %2931 = vmatpush3.bf16.msra.mxu1 %v3361_v0  ;;  %v3376_v0 = vld [vmem:[%s4365_s2 + $0x70] sm:$0xff]   ;;  %v464_v9 = vor.u32 %v463_v62, %v459_v61  ;;  %557 = vst.msk [vmem:[#allocation2 + $0x70] sm:$0xf] %vm323_vm0, %v460_v7  ;;  %1226 = vmatprep.mubr.bf16.mxu0 %v3857_v6  ;;  %v745_v24 = vld [vmem:[%s3588_s12 + $0x4] sm:$0xf]  ;;  %v752_v26 = vrot.slane %v744_v23, 5  ;;  %v706_v29 = vsel %vm3688_vm5, %v704_v47, %v705_v22 }
  0x5c   : > { %2932 = vmatprep.subr.bf16.mxu1 %v3366_v15  ;;  %v3866_v14 = vld [vmem:[#allocation2 + $0xa4] ss:$12 sps:$4 sm:$0xff]   ;;  %v754_v28 = vrot.slane %v745_v24, 5  ;;  %v707_v30 = vrot.slane %v705_v22, 4  ;;  %v474_v34 = vor.u32 %v473_v4, %v469_v2  ;;  %741 = vst.msk [vmem:[#allocation2 + $0xbc] sm:$0xf] %vm323_vm0, %v706_v29 }
  0x5d   : > { %v546_v15 = vld [vmem:[#allocation2 + $0x4] sm:$0x8]  ;;  %v465_v16 = vrot.slane %v464_v9, 4  ;;  %768 = vst.msk [vmem:[#allocation2 + $0xc8] sm:$0x8] %vm543_vm7, %v752_v26  ;;  %v3378_v38 = vld [vmem:[%s4365_s2 + $0x30] sm:$0xff]  }
  0x5e   : > { %v547_v17 = vsel %vm3853_vm10, %v3861_v12, %v546_v15  ;;  %1227 = vmatmul.mubr.bf16.gmra.mrb[8].mxu0 %v3864_v13  ;;  %v756_v37 = vrot.slane %v754_v28, 4  ;;  %743 = vst.msk [vmem:[#allocation2 + $0xc8] sm:$0x7] %vm742_vm8, %v707_v30  ;;  %v371_v45 = vshrl.u32 %v348_v60, 16  ;;  %v475_v47 = vrot.slane %v474_v34, 4  ;;  %v3381_v49 = vld [vmem:[%s4365_s2 + $0x38] sm:$0xff]  }
  0x5f   : > { %2933 = vmatpush3.bf16.msra.mxu1 %v3368_v35  ;;  %548 = vst [vmem:[#allocation2 + $0x4] sm:$0x8] %v547_v17  ;;  %v470_v25 = vsel %vm3699_vm6, %v465_v16, %v469_v2  ;;  %v753_v35 = vrot.slane %v752_v26, 4  ;;  %v317_v51 = vld [vmem:[%s3583_s8 + $0x28] sm:$0xf]  ;;  %v3389_v29 = vld [vmem:[%s4365_s2 + $0x1a0] sm:$0xff]  }
  0x60   : > { %2934 = vmatprep.subr.bf16.mxu1 %v3370_v44  ;;  %558 = vst.msk [vmem:[#allocation2 + $0x7c] sm:$0xf] %vm323_vm0, %v470_v25  ;;  %v758_v42 = vsel %vm3688_vm5, %v756_v37, %v757_v31  ;;  %v3379_v44 = vld [vmem:[%s4365_s2 + $0x198] sm:$0xff]   ;;  %v373_v50 = vrot.slane %v371_v45, 4  ;;  %v318_v52 = vld [vmem:[%s3583_s8 + $0x2c] sm:$0xf] }
  0x61   : > { %3109 = vmatmul.mubr.bf16.gmra.mrb[8].mxu1 %v3866_v14  ;;  %v755_v41 = vsel %vm3688_vm5, %v753_v35, %v754_v28  ;;  %770 = vst.msk [vmem:[#allocation2 + $0xe0] sm:$0xf] %vm323_vm0, %v758_v42  ;;  %3011 = vmatpush3.bf16.msra.mxu0 %v3379_v44  ;;  %v359_v53 = vld [vmem:[%s3583_s8 + $0x2c] sm:$0xf]  ;;  %334 = vst.msk [vmem:[#allocation2 + $0x84] sm:$0xf] %vm323_vm0, %v317_v51 }
  0x62   : > { %v789_v40 = vld [vmem:[#allocation2 + $0x6c] sm:$0xff]  ;;  %769 = vst.msk [vmem:[#allocation2 + $0xd4] sm:$0xf] %vm323_vm0, %v755_v41  ;;  %335 = vst.msk [vmem:[#allocation2 + $0x90] sm:$0xf] %vm323_vm0, %v318_v52  ;;  %v477_v58 = vshll.u32 %v359_v53, 16  ;;  %v374_v59 = vor.u32 %v373_v50, %v3861_v12 }
  0x63   : > { %2935 = vmatpush3.bf16.msra.mxu1 %v3371_v46  ;;  %v3380_v46 = vld [vmem:[%s4365_s2 + $0x78] sm:$0xff]   ;;  %v360_v57 = vld [vmem:[%s3583_s8 + $0x30] sm:$0xf]  ;;  %v481_v61 = vshrl.u32 %v359_v53, 16  ;;  %v307_v12 = vld [vmem:[%s3583_s8] sm:$0xf] }
  0x64   : > { %2936 = vmatprep.subr.bf16.mxu1 %v3376_v0  ;;  %v487_v62 = vshll.u32 %v360_v57, 16  ;;  %v491_v63 = vshrl.u32 %v360_v57, 16  ;;  %v3931_v0 = vld [vmem:[%s4365_s2 + $0x80] sm:$0xff]   ;;  %v479_v4 = vrot.slane %v477_v58, 5  ;;  %v375_v5 = vrot.slane %v374_v59, 4  ;;  %v3394_v50 = vld [vmem:[%s4365_s2 + $0x1e8] sm:$0xff]  }
  0x65   : > { %v3934_v2 = vld [vmem:[#allocation2 + $0xbc] ss:$12 sps:$4 sm:$0xff]   ;;  %v483_v7 = vrot.slane %v481_v61, 4  ;;  %v308_v15 = vld [vmem:[%s3583_s8 + $0x4] sm:$0xf]  ;;  %v759_v55 = vrot.slane %v757_v31, 4 }
  0x66   : > { %v489_v9 = vrot.slane %v487_v62, 5  ;;  %3112 = vmatprep.mubr.bf16.mxu1 %v3934_v2  ;;  %v480_v17 = vsel %vm3699_vm6, %v475_v47, %v479_v4  ;;  %324 = vst.msk [vmem:[#allocation2 + $0xc] sm:$0xf] %vm323_vm0, %v307_v12  ;;  %325 = vst.msk [vmem:[#allocation2 + $0x18] sm:$0xf] %vm323_vm0, %v308_v15  ;;  %v3388_v25 = vld [vmem:[%s4365_s2 + $0x1e0] sm:$0xff]  }
  0x67   : > { %2937 = vmatpush3.bf16.msra.mxu1 %v3378_v38  ;;  %v791_v54 = vld [vmem:[#allocation2 + $0x78] sm:$0xff]  ;;  %v484_v19 = vor.u32 %v483_v7, %v479_v4  ;;  %559 = vst.msk [vmem:[#allocation2 + $0x88] sm:$0xf] %vm323_vm0, %v480_v17  ;;  %v349_v20 = vld [vmem:[%s3583_s8 + $0x4] sm:$0xf]  ;;  %v493_v34 = vrot.slane %v491_v63, 4  ;;  %3012 = vmatprep.subr.bf16.mxu0 %v3388_v25 }
  0x68   : > { %2938 = vmatprep.subr.bf16.mxu1 %v3380_v46  ;;  %v3920_v56 = vld [vmem:[#allocation2 + $0x70] ss:$12 sps:$4 sm:$0xff]   ;;  %v3926_v60 = vcombine.low %v789_v40, %v791_v54  ;;  %v377_v22 = vshll.u32 %v349_v20, 16  ;;  %v381_v23 = vshrl.u32 %v349_v20, 16  ;;  %v320_v37 = vld [vmem:[%s3583_s8 + $0x34] sm:$0xf]  ;;  %3013 = vmatpush3.bf16.msra.mxu0 %v3389_v29 }
  0x69   : > { %1234 = vmatprep.mubr.bf16.mxu0 %v3920_v56  ;;  %v3375_v16 = vld [vmem:[#allocation2 + $0xd4] ss:$12 sps:$4 sm:$0xff]   ;;  %v485_v24 = vrot.slane %v484_v19, 4  ;;  %v319_v30 = vld [vmem:[%s3583_s8 + $0x30] sm:$0xf]  ;;  %v494_v44 = vor.u32 %v493_v34, %v489_v9  ;;  %3014 = vmatprep.subr.bf16.mxu0 %v3394_v50  ;;  %v3395_v61 = vld [vmem:[%s4365_s2 + $0x1a8] sm:$0xff]  }
  0x6a   : > { %1235 = vmatmul.mubr.bf16.gmra.mrb[12].mxu0 %v3926_v60  ;;  %3113 = vmatmul.mubr.bf16.gmra.mrb[12].mxu1 %v3375_v16  ;;  %v379_v26 = vrot.slane %v377_v22, 5  ;;  %v383_v28 = vrot.slane %v381_v23, 4  ;;  %336 = vst.msk [vmem:[#allocation2 + $0x9c] sm:$0xf] %vm323_vm0, %v319_v30  ;;  %v361_v38 = vld [vmem:[%s3583_s8 + $0x34] sm:$0xf] }
  0x6b   : > { %2939 = vmatpush3.bf16.msra.mxu1 %v3381_v49  ;;  %v490_v35 = vsel %vm3699_vm6, %v485_v24, %v489_v9  ;;  %v362_v40 = vld [vmem:[%s3583_s8 + $0x38] sm:$0xf]  ;;  %337 = vst.msk [vmem:[#allocation2 + $0xa8] sm:$0xf] %vm323_vm0, %v320_v37  ;;  %v497_v45 = vshll.u32 %v361_v38, 16  ;;  %v501_v46 = vshrl.u32 %v361_v38, 16 }
  0x6c   : > { %3116 = vmatprep.subr.bf16.mxu1 %v3931_v0  ;;  %560 = vst.msk [vmem:[#allocation2 + $0x94] sm:$0xf] %vm323_vm0, %v490_v35  ;;  %v380_v41 = vsel %vm3699_vm6, %v375_v5, %v379_v26  ;;  %v384_v42 = vor.u32 %v383_v28, %v379_v26  ;;  %v507_v47 = vshll.u32 %v362_v40, 16  ;;  %v511_v49 = vshrl.u32 %v362_v40, 16  ;;  %v321_v62 = vld [vmem:[%s3583_s8 + $0x38] sm:$0xf]  ;;  %3015 = vmatpush3.bf16.msra.mxu0 %v3395_v61 }
  0x6d   : > { %549 = vst.msk [vmem:[#allocation2 + $0x10] sm:$0xf] %vm323_vm0, %v380_v41  ;;  %v495_v52 = vrot.slane %v494_v44, 4  ;;  %v499_v53 = vrot.slane %v497_v45, 5  ;;  %v503_v54 = vrot.slane %v501_v46, 4  ;;  %v3400_v35 = vld [vmem:[%s4365_s2 + $0x1f0] sm:$0xff]  }
  0x6e   : > { %v385_v51 = vrot.slane %v384_v42, 4  ;;  %v509_v57 = vrot.slane %v507_v47, 5  ;;  %v322_v63 = vld [vmem:[%s3583_s8 + $0x3c] sm:$0xf]  ;;  %v513_v4 = vrot.slane %v511_v49, 4  ;;  %v793_v5 = vld [vmem:[#allocation2 + $0x84] sm:$0xff]  ;;  %3016 = vmatprep.subr.bf16.mxu0 %v3400_v35 }
  0x6f   : > { %v500_v59 = vsel %vm3699_vm6, %v495_v52, %v499_v53  ;;  %v504_v7 = vor.u32 %v503_v54, %v499_v53  ;;  %338 = vst.msk [vmem:[#allocation2 + $0xb4] sm:$0xf] %vm323_vm0, %v321_v62  ;;  %339 = vst.msk [vmem:[#allocation2 + $0xc0] sm:$0xf] %vm323_vm0, %v322_v63  ;;  %v569_v9 = vld [vmem:[%s3588_s12] sm:$0xf] }
  0x70   : > { %v390_v58 = vsel %vm3699_vm6, %v385_v51, %v3681_v39  ;;  %561 = vst.msk [vmem:[#allocation2 + $0xa0] sm:$0xf] %vm323_vm0, %v500_v59  ;;  %v363_v39 = vld [vmem:[%s3583_s8 + $0x3c] sm:$0xf]  ;;  %v514_v12 = vor.u32 %v513_v4, %v509_v57  ;;  %v574_v17 = vshll.u32 %v569_v9, 16  ;;  %v3401_v40 = vld [vmem:[%s4365_s2 + $0x1b0] sm:$0xff]  }
  0x71   : > { %550 = vst.msk [vmem:[#allocation2 + $0x1c] sm:$0xf] %vm323_vm0, %v390_v58  ;;  %v517_v15 = vshll.u32 %v363_v39, 16  ;;  %v521_v16 = vshrl.u32 %v363_v39, 16  ;;  %v505_v22 = vrot.slane %v504_v7, 4  ;;  %v577_v42 = vshrl.u32 %v569_v9, 16  ;;  %3017 = vmatpush3.bf16.msra.mxu0 %v3401_v40 }
  0x72   : > { %v515_v24 = vrot.slane %v514_v12, 4  ;;  %v566_v30 = vld [vmem:[#allocation2 + $0xc4] sm:$0xf]  ;;  %v576_v34 = vrot.slane %v574_v17, 5  ;;  %v340_v41 = vld [vmem:[%s3588_s12] sm:$0xf] }
  0x73   : > { %v795_v19 = vld [vmem:[#allocation2 + $0x90] sm:$0xff]  ;;  %v519_v25 = vrot.slane %v517_v15, 5  ;;  %v523_v26 = vrot.slane %v521_v16, 4  ;;  %v510_v29 = vsel %vm3699_vm6, %v505_v22, %v509_v57  ;;  %v341_v44 = vld [vmem:[%s3588_s12 + $0x4] sm:$0xf]  ;;  %v3393_v51 = vld [vmem:[%s4365_s2 + $0x88] sm:$0xff]  }
  0x74   : > { %v3984_v20 = vld [vmem:[#allocation2 + $0x88] ss:$12 sps:$4 sm:$0xff]   ;;  %v3986_v23 = vcombine.low %v793_v5, %v795_v19  ;;  %562 = vst.msk [vmem:[#allocation2 + $0xac] sm:$0xf] %vm323_vm0, %v510_v29  ;;  %344 = vst.msk [vmem:[#allocation2 + $0xcc] sm:$0xf] %vm323_vm0, %v340_v41 }
  0x75   : > { %1242 = vmatprep.mubr.bf16.mxu0 %v3984_v20  ;;  %v520_v37 = vsel %vm3699_vm6, %v515_v24, %v519_v25  ;;  %v524_v38 = vor.u32 %v523_v26, %v519_v25  ;;  %v570_v45 = vld [vmem:[%s3588_s12 + $0x4] sm:$0xf]  ;;  %v571_v46 = vld [vmem:[%s3588_s12 + $0x8] sm:$0xf]  ;;  %v3384_v47 = vld [vmem:[#allocation2 + $0xc] ss:$12 sps:$4 sm:$0xff]  }
  0x76   : > { %1243 = vmatmul.mubr.bf16.gmra.mrb[16].mxu0 %v3986_v23  ;;  %563 = vst.msk [vmem:[#allocation2 + $0xb8] sm:$0xf] %vm323_vm0, %v520_v37  ;;  %345 = vst.msk [vmem:[#allocation2 + $0xd8] sm:$0xf] %vm323_vm0, %v341_v44  ;;  %v579_v52 = vrot.slane %v577_v42, 4  ;;  %v583_v53 = vshll.u32 %v570_v45, 16 }
  0x77   : > { %v525_v50 = vrot.slane %v524_v38, 4  ;;  %v587_v54 = vshrl.u32 %v570_v45, 16  ;;  %v593_v57 = vshll.u32 %v571_v46, 16  ;;  %v3406_v59 = vld [vmem:[%s4365_s2 + $0x1f8] sm:$0xff]   ;;  %v3399_v61 = vld [vmem:[%s4365_s2 + $0x90] sm:$0xff]   ;;  %v597_v24 = vshrl.u32 %v571_v46, 16 }
  0x78   : > { %v3386_v49 = vld [vmem:[#allocation2 + $0x10] ss:$12 sps:$4 sm:$0xff]   ;;  %v580_v62 = vor.u32 %v579_v52, %v576_v34  ;;  %v585_v63 = vrot.slane %v583_v53, 5  ;;  %3018 = vmatprep.subr.bf16.mxu0 %v3406_v59  ;;  %v3408_v26 = vld [vmem:[%s4365_s2 + $0xa0] sm:$0xff]   ;;  %v662_v29 = vrot.slane %v661_v21, 4 }
  0x79   : > { %1564 = vmatprep.mubr.bf16.mxu1 %v3386_v49  ;;  %v567_v58 = vsel %vm3990_vm11, %v525_v50, %v566_v30  ;;  %v589_v4 = vrot.slane %v587_v54, 4  ;;  %v595_v5 = vrot.slane %v593_v57, 5  ;;  %v3407_v7 = vld [vmem:[%s4365_s2 + $0x1b8] sm:$0xff]   ;;  %v627_v30 = vld [vmem:[%s3583_s8 + $0x4] sm:$0xf]  ;;  %v599_v35 = vrot.slane %v597_v24, 4 }
  0x7a   : > { %1565 = vmatmul.mubr.bf16.vlgmr.msra.gmra.mrb[16].mxu1 %v3384_v47  ;;  %568 = vst [vmem:[#allocation2 + $0xc4] sm:$0xf] %v567_v58  ;;  %v4032_v9 = vld [vmem:[#allocation2 + $0x9c] ss:$12 sps:$4 sm:$0xff]   ;;  %v581_v12 = vrot.slane %v580_v62, 4  ;;  %3019 = vmatpush3.bf16.msra.mxu0 %v3407_v7  ;;  %v663_v37 = vrot.slane %v627_v30, 5 }
  0x7b   : > { %3117 = vmatpush3.bf16.msra.mxu1 %v3931_v0  ;;  %1572 = vmatprep.mubr.bf16.mxu1 %v3743_v33  ;;  %v4030_v39 = vld [vmem:[#allocation2 + $0xa0] ss:$12 sps:$4 sm:$0xff]   ;;  %v590_v15 = vor.u32 %v589_v4, %v585_v63  ;;  %v3405_v19 = vld [vmem:[%s4365_s2 + $0x98] sm:$0xff]   ;;  %v600_v18 = vor.u32 %v599_v35, %v595_v5  ;;  %v342_v42 = vld [vmem:[%s3588_s12 + $0x8] sm:$0xf] }
  0x7c   : > { %3118 = vmatprep.subr.bf16.mxu1 %v3393_v51  ;;  %1250 = vmatprep.mubr.bf16.mxu0 %v4030_v39  ;;  %v586_v16 = vsel %vm3699_vm6, %v581_v12, %v585_v63  ;;  %v4042_v33 = vld [vmem:[%s4365_s2 + $0x200] sm:$0xff]   ;;  %v664_v3 = vsel %vm3688_vm5, %v662_v29, %v663_v37  ;;  %v343_v44 = vld [vmem:[%s3588_s12 + $0xc] sm:$0xf]  ;;  %v3412_v45 = vld [vmem:[%s4365_s2 + $0xb0] sm:$0xff]   ;;  %346 = vst.msk [vmem:[#allocation2 + $0xe4] sm:$0xf] %vm323_vm0, %v342_v42 }
  0x7d   : > { %v591_v17 = vrot.slane %v590_v15, 4  ;;  %620 = vst.msk [vmem:[#allocation2 + $0xd0] sm:$0xf] %vm323_vm0, %v586_v16  ;;  %3148 = vmatprep.subr.bf16.mxu0 %v4042_v33  ;;  %727 = vst.msk [vmem:[#allocation2 + $0x14] sm:$0xf] %vm323_vm0, %v664_v3  ;;  %v3415_v27 = vld [vmem:[%s4365_s2 + $0x218] sm:$0xff]  }
  0x7e   : > { %1251 = vmatmul.mubr.bf16.gmra.mrb[20].mxu0 %v4032_v9  ;;  %v4071_v40 = vld [vmem:[#allocation2 + $0xb4] ss:$12 sps:$4 sm:$0xff]   ;;  %347 = vst.msk [vmem:[#allocation2 + $0xf0] sm:$0xf] %vm323_vm0, %v343_v44  ;;  %v572_v36 = vld [vmem:[%s3588_s12 + $0xc] sm:$0xf] }
  0x7f   : > { %3119 = vmatpush3.bf16.msra.mxu1 %v3393_v51  ;;  %v596_v0 = vsel %vm3699_vm6, %v591_v17, %v595_v5  ;;  %v603_v46 = vshll.u32 %v572_v36, 16  ;;  %v607_v47 = vshrl.u32 %v572_v36, 16  ;;  %v3414_v51 = vld [vmem:[%s4365_s2 + $0xb8] sm:$0xff]   ;;  %v623_v57 = vld [vmem:[#allocation2 + $0xf4] sm:$0xf] }
  0x80   : > { %3120 = vmatprep.subr.bf16.mxu1 %v3399_v61  ;;  %621 = vst.msk [vmem:[#allocation2 + $0xdc] sm:$0xf] %vm323_vm0, %v596_v0  ;;  %v4094_v52 = vld [vmem:[#allocation2 + $0xcc] ss:$12 sps:$4 sm:$0xff]   ;;  %v3419_v31 = vld [vmem:[%s4365_s2 + $0x230] sm:$0xff]  }
  0x81   : > { %v617_v22 = vld [vmem:[#allocation2 + $0xc4] sm:$0x8]  ;;  %v605_v49 = vrot.slane %v603_v46, 5  ;;  %v609_v50 = vrot.slane %v607_v47, 4  ;;  %v3434_v28 = vld [vmem:[#allocation2 + $0x5c] ss:$12 sps:$4 sm:$0xff]  }
  0x82   : > { %1573 = vmatmul.mubr.bf16.gmra.mrb[20].mxu1 %v3741_v32  ;;  %v618_v25 = vsel %vm3853_vm10, %v576_v34, %v617_v22  ;;  %v3410_v32 = vld [vmem:[%s4365_s2 + $0xa8] sm:$0xff]   ;;  %v665_v34 = vrot.slane %v663_v37, 4  ;;  %v3425_v5 = vld [vmem:[#allocation2 + $0xa4] ss:$12 sps:$4 sm:$0xff]  }
  0x83   : > { %619 = vst [vmem:[#allocation2 + $0xc4] sm:$0x8] %v618_v25  ;;  %1580 = vmatprep.mubr.bf16.mxu1 %v3792_v8  ;;  %3121 = vmatpush3.bf16.msra.mxu1 %v3399_v61  ;;  %v610_v54 = vor.u32 %v609_v50, %v605_v49  ;;  %v747_v61 = vld [vmem:[%s3588_s12 + $0xc] sm:$0xf]  ;;  %v3424_v7 = vld [vmem:[#allocation2 + $0x44] ss:$12 sps:$4 sm:$0xff]  }
  0x84   : > { %3122 = vmatprep.subr.bf16.mxu1 %v3405_v19  ;;  %v667_v41 = vsel %vm3688_vm5, %v665_v34, %v666_v43  ;;  %v601_v43 = vrot.slane %v600_v18, 4  ;;  %v760_v62 = vrot.slane %v747_v61, 5  ;;  %v3430_v15 = vld [vmem:[#allocation2 + $0x8c] ss:$12 sps:$4 sm:$0xff]   ;;  %s2803_s12 = sshll.u32 (%p3566_p5), %s3549_s19, 3 }
  0x85   : > { %728 = vst.msk [vmem:[#allocation2 + $0x20] sm:$0xf] %vm323_vm0, %v667_v41  ;;  %v611_v58 = vrot.slane %v610_v54, 4  ;;  %s2444_s20 = ssub.s32 (%p3566_p5), 13, %s2803_s12 }
  0x86   : > { %v606_v53 = vsel %vm3699_vm6, %v601_v43, %v605_v49  ;;  %v761_v63 = vsel %vm3688_vm5, %v759_v55, %v760_v62  ;;  %v762_v4 = vrot.slane %v760_v62, 4  ;;  %p2445_p13 = scmp.lt.s32.totalorder (%p3566_p5), %s2444_s20, 8 }
  0x87   : > { %3123 = vmatpush3.bf16.msra.mxu1 %v3405_v19  ;;  %v4066_v38 = vld [vmem:[#allocation2 + $0xd0] ss:$12 sps:$4 sm:$0xff]   ;;  %622 = vst.msk [vmem:[#allocation2 + $0xe8] sm:$0xf] %vm323_vm0, %v606_v53  ;;  %v624_v59 = vsel %vm3990_vm11, %v611_v58, %v623_v57  ;;  %771 = vst.msk [vmem:[#allocation2 + $0xec] sm:$0xf] %vm323_vm0, %v761_v63 }
  0x88   : > { %3124 = vmatprep.subr.bf16.mxu1 %v3408_v26  ;;  %625 = vst [vmem:[#allocation2 + $0xf4] sm:$0xf] %v624_v59  ;;  %772 = vst.msk [vmem:[#allocation2 + $0xf8] sm:$0x7] %vm742_vm8, %v762_v4 }
  0x8a   : > { %v4069_v21 = vld [vmem:[#allocation2 + $0xb8] ss:$12 sps:$4 sm:$0xff]   ;;  %1581 = vmatmul.mubr.bf16.gmra.mrb[24].mxu1 %v3794_v10 }
  0x8b   : > { %1588 = vmatprep.mubr.bf16.mxu1 %v3857_v6  ;;  %3125 = vmatpush3.bf16.msra.mxu1 %v3408_v26 }
  0x8c   : > { %1258 = vmatprep.mubr.bf16.mxu0 %v4069_v21  ;;  %3126 = vmatprep.subr.bf16.mxu1 %v3410_v32 }
  0x8d   : > { %1259 = vmatmul.mubr.bf16.gmra.mrb[24].mxu0 %v4071_v40 }
  0x8e   : > { %1266 = vmatprep.mubr.bf16.mxu0 %v4066_v38 }
  0x8f   : > { %3127 = vmatpush3.bf16.msra.mxu1 %v3410_v32  ;;  %v3431_v12 = vld [vmem:[#allocation2 + $0xec] ss:$12 sps:$4 sm:$0xff]  }
  0x90   : > { %3128 = vmatprep.subr.bf16.mxu1 %v3412_v45 }
  0x92   : > { %1589 = vmatmul.mubr.bf16.gmra.mrb[28].mxu1 %v3864_v13 }
  0x93   : > { %1596 = vmatprep.mubr.bf16.mxu1 %v3920_v56  ;;  %3129 = vmatpush3.bf16.msra.mxu1 %v3412_v45 }
  0x94   : > { %3130 = vmatprep.subr.bf16.mxu1 %v3414_v51 }
  0x95   : > { %1267 = vmatmul.mubr.bf16.gmra.mrb[28].mxu0 %v4094_v52 }
  0x96   : > { %2111 = vmatprep.mubr.bf16.mxu0 %v3792_v8  ;;  %v3411_v8 = vld [vmem:[%s4365_s2 + $0x208] sm:$0xff]  }
  0x97   : > { %3131 = vmatpush3.bf16.msra.mxu1 %v3414_v51 }
  0x98   : > { %3180 = vmatprep.subr.bf16.mxu1 %v4042_v33 }
  0x9a   : > { %1597 = vmatmul.mubr.bf16.gmra.mrb[32].mxu1 %v3926_v60 }
  0x9b   : > { %1604 = vmatprep.mubr.bf16.mxu1 %v3984_v20 }
  0x9d   : > { %2112 = vmatmul.mubr.bf16.vlgmr.msra.gmra.mrb[32].mxu0 %v3794_v10  ;;  %v3417_v10 = vld [vmem:[%s4365_s2 + $0x220] sm:$0xff]  }
  0x9e   : > { %3149 = vmatpush3.bf16.msra.mxu0 %v4042_v33  ;;  %2119 = vmatprep.mubr.bf16.mxu0 %v3857_v6  ;;  %v3418_v6 = vld [vmem:[%s4365_s2 + $0x228] sm:$0xff]  }
  0x9f   : > { %3150 = vmatprep.subr.bf16.mxu0 %v3411_v8 }
  0xa2   : > { %1605 = vmatmul.mubr.bf16.gmra.mrb[36].mxu1 %v3986_v23  ;;  %3151 = vmatpush3.bf16.msra.mxu0 %v3411_v8 }
  0xa3   : > { %1612 = vmatprep.mubr.bf16.mxu1 %v4030_v39  ;;  %3152 = vmatprep.subr.bf16.mxu0 %v3413_v48 }
  0xa5   : > { %2120 = vmatmul.mubr.bf16.gmra.mrb[36].mxu0 %v3864_v13  ;;  %v3416_v13 = vld [vmem:[#allocation2 + $0x14] ss:$12 sps:$4 sm:$0xff]  }
  0xa6   : > { %2127 = vmatprep.mubr.bf16.mxu0 %v3920_v56  ;;  %3153 = vmatpush3.bf16.msra.mxu0 %v3413_v48  ;;  %v3423_v56 = vld [vmem:[%s4365_s2 + $0x238] sm:$0xff]  }
  0xa7   : > { %3154 = vmatprep.subr.bf16.mxu0 %v3415_v27 }
  0xaa   : > { %1613 = vmatmul.mubr.bf16.gmra.mrb[40].mxu1 %v4032_v9  ;;  %3155 = vmatpush3.bf16.msra.mxu0 %v3415_v27 }
  0xab   : > { %1620 = vmatprep.mubr.bf16.mxu1 %v4069_v21  ;;  %3156 = vmatprep.subr.bf16.mxu0 %v3417_v10 }
  0xad   : > { %2128 = vmatmul.mubr.bf16.gmra.mrb[40].mxu0 %v3926_v60  ;;  %v3432_v60 = vld [vmem:[#allocation2 + $0x2c] ss:$12 sps:$4 sm:$0xff]  }
  0xae   : > { %2135 = vmatprep.mubr.bf16.mxu0 %v3984_v20  ;;  %3157 = vmatpush3.bf16.msra.mxu0 %v3417_v10  ;;  %v3433_v20 = vld [vmem:[#allocation2 + $0x44] ss:$12 sps:$4 sm:$0xff]  }
  0xaf   : > { %3158 = vmatprep.subr.bf16.mxu0 %v3418_v6 }
  0xb2   : > { %1621 = vmatmul.mubr.bf16.gmra.mrb[44].mxu1 %v4071_v40  ;;  %3159 = vmatpush3.bf16.msra.mxu0 %v3418_v6 }
  0xb3   : > { %3132 = vmatprep.mubr.bf16.mxu1 %v3416_v13  ;;  %3160 = vmatprep.subr.bf16.mxu0 %v3419_v31 }
  0xb5   : > { %2136 = vmatmul.mubr.bf16.gmra.mrb[44].mxu0 %v3986_v23  ;;  %v3420_v23 = vld [vmem:[#allocation2 + $0xe8] ss:$12 sps:$4 sm:$0xff]  }
  0xb6   : > { %2143 = vmatprep.mubr.bf16.mxu0 %v4030_v39  ;;  %3161 = vmatpush3.bf16.msra.mxu0 %v3419_v31  ;;  %v3429_v39 = vld [vmem:[#allocation2 + $0xd4] ss:$12 sps:$4 sm:$0xff]  }
  0xb7   : > { %3162 = vmatprep.subr.bf16.mxu0 %v3423_v56 }
  0xba   : > { %3133 = vmatmul.mubr.bf16.vlgmr.msra.gmra.mrb[0].mxu1 %v3432_v60  ;;  %3163 = vmatpush3.bf16.msra.mxu0 %v3423_v56 }
  0xbb   : > { %3188 = vmatpush3.bf16.msra.mxu1 %v4042_v33  ;;  %3136 = vmatprep.mubr.bf16.mxu1 %v3433_v20 }
  0xbc   : > { %3181 = vmatprep.subr.bf16.mxu1 %v3411_v8 }
  0xbd   : > { %2144 = vmatmul.mubr.bf16.gmra.mrb[48].mxu0 %v4032_v9  ;;  %v3428_v9 = vld [vmem:[#allocation2 + $0x74] ss:$12 sps:$4 sm:$0xff]  }
  0xbe   : > { %2151 = vmatprep.mubr.bf16.mxu0 %v4069_v21 }
  0xbf   : > { %3189 = vmatpush3.bf16.msra.mxu1 %v3411_v8 }
  0xc0   : > { %3182 = vmatprep.subr.bf16.mxu1 %v3413_v48 }
  0xc2   : > { %3137 = vmatmul.mubr.bf16.gmra.mrb[4].mxu1 %v3434_v28 }
  0xc3   : > { %3190 = vmatpush3.bf16.msra.mxu1 %v3413_v48  ;;  %3140 = vmatprep.mubr.bf16.mxu1 %v3796_v11  ;;  %v3422_v11 = vld [vmem:[#allocation2 + $0xe4] ss:$12 sps:$4 sm:$0xff]  }
  0xc4   : > { %3183 = vmatprep.subr.bf16.mxu1 %v3415_v27 }
  0xc5   : > { %2152 = vmatmul.mubr.bf16.gmra.mrb[52].mxu0 %v4071_v40 }
  0xc6   : > { %2159 = vmatprep.mubr.bf16.mxu0 %v4066_v38 }
  0xc7   : > { %3191 = vmatpush3.bf16.msra.mxu1 %v3415_v27 }
  0xc8   : > { %3184 = vmatprep.subr.bf16.mxu1 %v3417_v10 }
  0xca   : > { %3141 = vmatmul.mubr.bf16.gmra.mrb[8].mxu1 %v3850_v1  ;;  %v3427_v1 = vld [vmem:[#allocation2 + $0xbc] ss:$12 sps:$4 sm:$0xff]  }
  0xcb   : > { %3192 = vmatpush3.bf16.msra.mxu1 %v3417_v10  ;;  %3144 = vmatprep.mubr.bf16.mxu1 %v3866_v14  ;;  %v3426_v14 = vld [vmem:[#allocation2 + $0x5c] ss:$12 sps:$4 sm:$0xff]  }
  0xcc   : > { %3185 = vmatprep.subr.bf16.mxu1 %v3418_v6 }
  0xcd   : > { %2160 = vmatmul.mubr.bf16.gmra.mrb[56].mxu0 %v4094_v52 }
  0xce   : > { %2167 = vmatprep.mubr.bf16.mxu0 %v3420_v23 }
  0xcf   : > { %3193 = vmatpush3.bf16.msra.mxu1 %v3418_v6 }
  0xd0   : > { %3186 = vmatprep.subr.bf16.mxu1 %v3419_v31 }
  0xd2   : > { %3145 = vmatmul.mubr.bf16.gmra.mrb[12].mxu1 %v3934_v2 }
  0xd3   : > { %3194 = vmatpush3.bf16.msra.mxu1 %v3419_v31  ;;  %3172 = vmatprep.mubr.bf16.mxu1 %v3425_v5 }
  0xd4   : > { %3187 = vmatprep.subr.bf16.mxu1 %v3423_v56 }
  0xd5   : > { %2168 = vmatmul.mubr.bf16.gmra.mrb[60].mxu0 %v3422_v11 }
  0xd6   : > { %3164 = vmatprep.mubr.bf16.mxu0 %v3424_v7 }
  0xd7   : > { %3195 = vmatpush3.bf16.msra.mxu1 %v3423_v56 }
  0xda   : > { %3173 = vmatmul.mubr.bf16.vlgmr.msra.gmra.mrb[8].mxu1 %v3427_v1 }
  0xdb   : > { %3176 = vmatprep.mubr.bf16.mxu1 %v3429_v39 }
  0xdd   : > { %3165 = vmatmul.mubr.bf16.vlgmr.msra.gmra.mrb[64].mxu0 %v3426_v14 }
  0xde   : > { %3168 = vmatprep.mubr.bf16.mxu0 %v3428_v9 }
  0xe2   : > { %3177 = vmatmul.mubr.bf16.gmra.mrb[12].mxu1 %v3431_v12 }
  0xe5   : > { %3169 = vmatmul.mubr.bf16.gmra.mrb[68].mxu0 %v3430_v15 }
 0x121   : > { %v2860_v2 = vpop.f32.mrb[0].mxu0 }
 0x122   : > { %v2861_v16 = vpop.f32.mrb[1].mxu0 }
 0x123   : > { %v2862_v17 = vadd.f32 %v2861_v16, %v2860_v2  ;;  %v2863_v33 = vpop.f32.mrb[2].mxu0 }
 0x124   : > { %v2864_v0 = vpop.f32.mrb[3].mxu0 }
 0x125   : > { %v2865_v19 = vadd.f32 %v2864_v0, %v2863_v33 }
 0x129   : > { %v2866_v22 = vpop.f32.mrb[4].mxu0 }
 0x12a   : > { %v2867_v24 = vpop.f32.mrb[5].mxu0 }
 0x12b   : > { %v2868_v25 = vadd.f32 %v2867_v24, %v2866_v22  ;;  %v2869_v26 = vpop.f32.mrb[6].mxu0 }
 0x12c   : > { %v2870_v29 = vpop.f32.mrb[7].mxu0 }
 0x12d   : > { %v2871_v30 = vadd.f32 %v2870_v29, %v2869_v26 }
 0x131   : > { %v2872_v35 = vpop.f32.mrb[8].mxu0 }
 0x132   : > { %v2873_v37 = vpop.f32.mrb[9].mxu0 }
 0x133   : > { %v2874_v32 = vadd.f32 %v2873_v37, %v2872_v35  ;;  %v2875_v3 = vpop.f32.mrb[10].mxu0 }
 0x134   : > { %v2876_v34 = vpop.f32.mrb[11].mxu0 }
 0x135   : > { %v2877_v38 = vadd.f32 %v2876_v34, %v2875_v3 }
 0x13d   : > { %v2878_v18 = vpop.f32.mrb[12].mxu0 }
 0x13e   : > { %v2879_v21 = vpop.f32.mrb[13].mxu0 }
 0x13f   : > { %v2880_v40 = vadd.f32 %v2879_v21, %v2878_v18  ;;  %v2881_v41 = vpop.f32.mrb[14].mxu0 }
 0x140   : > { %v2882_v42 = vpop.f32.mrb[15].mxu0 }
 0x141   : > { %v2883_v44 = vadd.f32 %v2882_v42, %v2881_v41 }
 0x149   : > { %v2884_v45 = vpop.f32.mrb[16].mxu0 }
 0x14a   : > { %v2885_v36 = vpop.f32.mrb[17].mxu0 }
 0x14b   : > { %v2886_v43 = vadd.f32 %v2885_v36, %v2884_v45  ;;  %v2887_v46 = vpop.f32.mrb[18].mxu0 }
 0x14c   : > { %v2888_v47 = vpop.f32.mrb[19].mxu0 }
 0x14d   : > { %v2889_v49 = vadd.f32 %v2888_v47, %v2887_v46  ;;  %v2940_v50 = vpop.f32.mrb[16].mxu1 }
 0x14e   : > { %v2941_v51 = vpop.f32.mrb[17].mxu1 }
 0x14f   : > { %v2942_v52 = vadd.f32 %v2941_v51, %v2940_v50  ;;  %v2943_v53 = vpop.f32.mrb[18].mxu1 }
 0x150   : > { %v2944_v54 = vpop.f32.mrb[19].mxu1 }
 0x151   : > { %v2945_v57 = vadd.f32 %v2944_v54, %v2943_v53  ;;  %v4160_v58 = vadd.f32 %v2942_v52, %v2862_v17  ;;  %v2890_v59 = vpop.f32.mrb[20].mxu0 }
 0x152   : > { %v2891_v55 = vpop.f32.mrb[21].mxu0 }
 0x153   : > { %v4162_v61 = vadd.f32 %v2945_v57, %v2865_v19  ;;  %v2892_v62 = vadd.f32 %v2891_v55, %v2890_v59  ;;  %v2893_v63 = vpop.f32.mrb[22].mxu0 }
 0x154   : > { %v2894_v8 = vpop.f32.mrb[23].mxu0 }
 0x155   : > { %v2946_v4 = vpop.f32.mrb[20].mxu1  ;;  %v2895_v27 = vadd.f32 %v2894_v8, %v2893_v63 }
 0x156   : > { %v2947_v48 = vpop.f32.mrb[21].mxu1 }
 0x157   : > { %v2948_v10 = vadd.f32 %v2947_v48, %v2946_v4  ;;  %v2949_v6 = vpop.f32.mrb[22].mxu1 }
 0x158   : > { %v2950_v13 = vpop.f32.mrb[23].mxu1 }
 0x159   : > { %v2951_v31 = vadd.f32 %v2950_v13, %v2949_v6  ;;  %v4164_v56 = vadd.f32 %v2948_v10, %v2868_v25 }
 0x15b   : > { %v4166_v60 = vadd.f32 %v2951_v31, %v2871_v30 }
 0x15d   : > { %v2952_v20 = vpop.f32.mrb[24].mxu1 }
 0x15e   : > { %v2953_v28 = vpop.f32.mrb[25].mxu1 }
 0x15f   : > { %v2954_v23 = vadd.f32 %v2953_v28, %v2952_v20  ;;  %v2955_v5 = vpop.f32.mrb[26].mxu1 }
 0x160   : > { %v2896_v11 = vpop.f32.mrb[24].mxu0  ;;  %v2956_v7 = vpop.f32.mrb[27].mxu1 }
 0x161   : > { %v2897_v1 = vpop.f32.mrb[25].mxu0  ;;  %v2957_v39 = vadd.f32 %v2956_v7, %v2955_v5  ;;  %v4168_v14 = vadd.f32 %v2954_v23, %v2874_v32 }
 0x162   : > { %v2898_v9 = vadd.f32 %v2897_v1, %v2896_v11  ;;  %v2899_v12 = vpop.f32.mrb[26].mxu0 }
 0x163   : > { %v2900_v15 = vpop.f32.mrb[27].mxu0  ;;  %v4170_v2 = vadd.f32 %v2957_v39, %v2877_v38 }
 0x164   : > { %v2901_v16 = vadd.f32 %v2900_v15, %v2899_v12 }
 0x165   : > { %v2958_v17 = vpop.f32.mrb[28].mxu1 }
 0x166   : > { %v2959_v33 = vpop.f32.mrb[29].mxu1 }
 0x167   : > { %v2960_v0 = vadd.f32 %v2959_v33, %v2958_v17  ;;  %v2961_v19 = vpop.f32.mrb[30].mxu1 }
 0x168   : > { %v2902_v22 = vpop.f32.mrb[28].mxu0  ;;  %v2962_v24 = vpop.f32.mrb[31].mxu1 }
 0x169   : > { %v2903_v25 = vpop.f32.mrb[29].mxu0  ;;  %v2963_v26 = vadd.f32 %v2962_v24, %v2961_v19  ;;  %v4172_v29 = vadd.f32 %v2960_v0, %v2880_v40 }
 0x16a   : > { %v2904_v30 = vadd.f32 %v2903_v25, %v2902_v22  ;;  %v2905_v35 = vpop.f32.mrb[30].mxu0 }
 0x16b   : > { %v2906_v37 = vpop.f32.mrb[31].mxu0  ;;  %v4174_v32 = vadd.f32 %v2963_v26, %v2883_v44 }
 0x16c   : > { %v2907_v3 = vadd.f32 %v2906_v37, %v2905_v35 }
 0x16d   : > { %v2964_v34 = vpop.f32.mrb[32].mxu1 }
 0x16e   : > { %v2965_v38 = vpop.f32.mrb[33].mxu1 }
 0x16f   : > { %v2966_v18 = vadd.f32 %v2965_v38, %v2964_v34  ;;  %v2967_v21 = vpop.f32.mrb[34].mxu1 }
 0x170   : > { %v3020_v41 = vpop.f32.mrb[32].mxu0  ;;  %v2968_v42 = vpop.f32.mrb[35].mxu1 }
 0x171   : > { %v4176_v45 = vadd.f32 %v2966_v18, %v2886_v43  ;;  %v3021_v36 = vpop.f32.mrb[33].mxu0  ;;  %v2969_v46 = vadd.f32 %v2968_v42, %v2967_v21 }
 0x172   : > { %v3022_v47 = vadd.f32 %v3021_v36, %v3020_v41  ;;  %v3023_v50 = vpop.f32.mrb[34].mxu0 }
 0x173   : > { %v4178_v40 = vadd.f32 %v2969_v46, %v2889_v49  ;;  %v3024_v51 = vpop.f32.mrb[35].mxu0 }
 0x174   : > { %v3025_v52 = vadd.f32 %v3024_v51, %v3023_v50 }
 0x175   : > { %v2970_v53 = vpop.f32.mrb[36].mxu1 }
 0x176   : > { %v2971_v44 = vpop.f32.mrb[37].mxu1 }
 0x177   : > { %v2972_v54 = vadd.f32 %v2971_v44, %v2970_v53  ;;  %v2973_v57 = vpop.f32.mrb[38].mxu1 }
 0x178   : > { %v3026_v59 = vpop.f32.mrb[36].mxu0  ;;  %v2974_v55 = vpop.f32.mrb[39].mxu1 }
 0x179   : > { %v4180_v63 = vadd.f32 %v2972_v54, %v2892_v62  ;;  %v3027_v4 = vpop.f32.mrb[37].mxu0  ;;  %v2975_v8 = vadd.f32 %v2974_v55, %v2973_v57 }
 0x17a   : > { %v3028_v43 = vadd.f32 %v3027_v4, %v3026_v59  ;;  %v3029_v48 = vpop.f32.mrb[38].mxu0 }
 0x17b   : > { %v4182_v10 = vadd.f32 %v2975_v8, %v2895_v27  ;;  %v3030_v6 = vpop.f32.mrb[39].mxu0 }
 0x17c   : > { %v3031_v13 = vadd.f32 %v3030_v6, %v3029_v48 }
 0x17d   : > { %v2976_v49 = vpop.f32.mrb[40].mxu1 }
 0x17e   : > { %v2977_v31 = vpop.f32.mrb[41].mxu1 }
 0x17f   : > { %v2978_v20 = vadd.f32 %v2977_v31, %v2976_v49  ;;  %v2979_v28 = vpop.f32.mrb[42].mxu1 }
 0x180   : > { %v3032_v23 = vpop.f32.mrb[40].mxu0  ;;  %v2980_v5 = vpop.f32.mrb[43].mxu1 }
 0x181   : > { %v4184_v11 = vadd.f32 %v2978_v20, %v2898_v9  ;;  %v3033_v7 = vpop.f32.mrb[41].mxu0  ;;  %v2981_v1 = vadd.f32 %v2980_v5, %v2979_v28 }
 0x182   : > { %v3034_v62 = vadd.f32 %v3033_v7, %v3032_v23  ;;  %v3035_v39 = vpop.f32.mrb[42].mxu0 }
 0x183   : > { %v4186_v12 = vadd.f32 %v2981_v1, %v2901_v16  ;;  %v3036_v15 = vpop.f32.mrb[43].mxu0 }
 0x184   : > { %v3037_v17 = vadd.f32 %v3036_v15, %v3035_v39 }
 0x185   : > { %v2982_v27 = vpop.f32.mrb[44].mxu1 }
 0x186   : > { %v2983_v33 = vpop.f32.mrb[45].mxu1 }
 0x187   : > { %v2984_v0 = vadd.f32 %v2983_v33, %v2982_v27  ;;  %v2985_v19 = vpop.f32.mrb[46].mxu1 }
 0x188   : > { %v3038_v22 = vpop.f32.mrb[44].mxu0  ;;  %v2986_v24 = vpop.f32.mrb[47].mxu1 }
 0x189   : > { %v3240_v25 = vadd.f32 %v2984_v0, %v2904_v30  ;;  %v3039_v26 = vpop.f32.mrb[45].mxu0  ;;  %v2987_v35 = vadd.f32 %v2986_v24, %v2985_v19 }
 0x18a   : > { %v3040_v37 = vadd.f32 %v3039_v26, %v3038_v22  ;;  %v3041_v9 = vpop.f32.mrb[46].mxu0 }
 0x18b   : > { %v3246_v34 = vadd.f32 %v2987_v35, %v2907_v3  ;;  %v3042_v38 = vpop.f32.mrb[47].mxu0 }
 0x18c   : > { %v3043_v18 = vadd.f32 %v3042_v38, %v3041_v9 }
 0x18d   : > { %v3134_v21 = vpop.f32.mrb[0].mxu1 }
 0x18e   : > { %v3197_v16 = vadd.f32 %v4164_v56, %v3134_v21  ;;  %v1663_v41 = vpop.f32.mrb[1].mxu1 }
 0x18f   : > { %v3201_v42 = vadd.f32 %v4160_v58, %v1663_v41  ;;  %v3135_v36 = vpop.f32.mrb[2].mxu1 }
 0x190   : > { %v3044_v46 = vpop.f32.mrb[48].mxu0  ;;  %v3205_v50 = vadd.f32 %v4166_v60, %v3135_v36  ;;  %v1666_v51 = vpop.f32.mrb[3].mxu1  ;;  %v3198_v53 = vadd.f32 %v3197_v16, %v3028_v43 }
 0x191   : > { %v3045_v30 = vpop.f32.mrb[49].mxu0  ;;  %v3209_v44 = vadd.f32 %v4162_v61, %v1666_v51  ;;  %v3202_v54 = vadd.f32 %v3201_v42, %v3022_v47 }
 0x192   : > { %v3046_v57 = vadd.f32 %v3045_v30, %v3044_v46  ;;  %v3047_v3 = vpop.f32.mrb[50].mxu0  ;;  %v4192_v59 = vadd.f32 %v3205_v50, %v3031_v13 }
 0x193   : > { %v3048_v55 = vpop.f32.mrb[51].mxu0  ;;  %v4194_v4 = vadd.f32 %v3209_v44, %v3025_v52 }
 0x194   : > { %v3049_v56 = vadd.f32 %v3048_v55, %v3047_v3  ;;  %v3232_v58 = vadd.f32 %v4176_v45, %v3046_v57 }
 0x195   : > { %v3138_v8 = vpop.f32.mrb[4].mxu1 }
 0x196   : > { %v3213_v48 = vadd.f32 %v4172_v29, %v3138_v8  ;;  %v1679_v60 = vpop.f32.mrb[5].mxu1  ;;  %v3238_v43 = vadd.f32 %v4178_v40, %v3049_v56 }
 0x197   : > { %v3217_v6 = vadd.f32 %v4168_v14, %v1679_v60  ;;  %v3139_v61 = vpop.f32.mrb[6].mxu1 }
 0x198   : > { %v3050_v47 = vpop.f32.mrb[52].mxu0  ;;  %v3221_v49 = vadd.f32 %v4174_v32, %v3139_v61  ;;  %v1682_v13 = vpop.f32.mrb[7].mxu1  ;;  %v4201_v31 = vadd.f32 %v3213_v48, %v3040_v37 }
 0x199   : > { %v3051_v52 = vpop.f32.mrb[53].mxu0  ;;  %v3225_v20 = vadd.f32 %v4170_v2, %v1682_v13  ;;  %v4204_v28 = vadd.f32 %v3217_v6, %v3034_v62 }
 0x19a   : > { %v3052_v45 = vadd.f32 %v3051_v52, %v3050_v47  ;;  %v3053_v23 = vpop.f32.mrb[54].mxu0  ;;  %v4206_v29 = vadd.f32 %v3221_v49, %v3043_v18 }
 0x19b   : > { %v3054_v5 = vpop.f32.mrb[55].mxu0  ;;  %v4208_v40 = vadd.f32 %v3225_v20, %v3037_v17  ;;  %v2785_v20 = vld [vmem:[%s3590_s13 + $0x24] sm:$0x7] }
 0x19c   : > { %v3055_v14 = vadd.f32 %v3054_v5, %v3053_v23  ;;  %v3229_v7 = vadd.f32 %v4180_v63, %v3052_v45 }
 0x19e   : > { %v3235_v32 = vadd.f32 %v4182_v10, %v3055_v14  ;;  %v4219_v10 = vld [vmem:[%s4366_s3] ss:$0 sm:$0xff] }
 0x1a0   : > { %v3056_v1 = vpop.f32.mrb[56].mxu0 }
 0x1a1   : > { %v3057_v39 = vpop.f32.mrb[57].mxu0 }
 0x1a2   : > { %v3058_v15 = vadd.f32 %v3057_v39, %v3056_v1  ;;  %v3059_v27 = vpop.f32.mrb[58].mxu0 }
 0x1a3   : > { %v3060_v33 = vpop.f32.mrb[59].mxu0 }
 0x1a4   : > { %v3061_v2 = vadd.f32 %v3060_v33, %v3059_v27  ;;  %v3244_v62 = vadd.f32 %v4184_v11, %v3058_v15  ;;  %v2770_v15 = vld [vmem:[%s3590_s13 + $0xc] sm:$0x7] }
 0x1a6   : > { %v4214_v0 = vadd.f32 %v4186_v12, %v3061_v2 }
 0x1a8   : > { %v3062_v19 = vpop.f32.mrb[60].mxu0 }
 0x1a9   : > { %v3063_v22 = vpop.f32.mrb[61].mxu0 }
 0x1aa   : > { %v3064_v17 = vadd.f32 %v3063_v22, %v3062_v19  ;;  %v3065_v24 = vpop.f32.mrb[62].mxu0 }
 0x1ab   : > { %v3066_v26 = vpop.f32.mrb[63].mxu0 }
 0x1ac   : > { %v3067_v35 = vadd.f32 %v3066_v26, %v3065_v24  ;;  %v3241_v63 = vadd.f32 %v3240_v25, %v3064_v17  ;;  %v2348_v24 = vld [vmem:[%s3590_s13 + $0x4] sm:$0x7] }
 0x1ad   : > { %v3174_v37 = vpop.f32.mrb[8].mxu1 }
 0x1ae   : > { %v3230_v9 = vadd.f32 %v3229_v7, %v3174_v37  ;;  %v2242_v38 = vpop.f32.mrb[9].mxu1  ;;  %v4221_v18 = vadd.f32 %v3246_v34, %v3067_v35 }
 0x1af   : > { %v3233_v11 = vadd.f32 %v3232_v58, %v2242_v38  ;;  %v3175_v12 = vpop.f32.mrb[10].mxu1 }
 0x1b0   : > { %v3166_v21 = vpop.f32.mrb[64].mxu0  ;;  %v2306_v16 = vadd.f32 %v3230_v9, %v4219_v10  ;;  %v3236_v41 = vadd.f32 %v3235_v32, %v3175_v12  ;;  %v2245_v42 = vpop.f32.mrb[11].mxu1 }
 0x1b1   : > { %v3199_v36 = vadd.f32 %v3198_v53, %v3166_v21  ;;  %v2210_v25 = vpop.f32.mrb[65].mxu0  ;;  %v2304_v46 = vadd.f32 %v3233_v11, %v4219_v10  ;;  %v3239_v50 = vadd.f32 %v3238_v43, %v2245_v42 }
 0x1b2   : > { %v2322_v51 = vmax.f32 %v2306_v16, 0.0  ;;  %v3203_v30 = vadd.f32 %v3202_v54, %v2210_v25  ;;  %v3167_v44 = vpop.f32.mrb[66].mxu0  ;;  %v2307_v34 = vadd.f32 %v3236_v41, %v4219_v10 }
 0x1b3   : > { %v2298_v57 = vadd.f32 %v3199_v36, %v4219_v10  ;;  %v2320_v3 = vmax.f32 %v2304_v46, 0.0  ;;  %v3207_v55 = vadd.f32 %v4192_v59, %v3167_v44  ;;  %v2213_v56 = vpop.f32.mrb[67].mxu0  ;;  %v2305_v53 = vadd.f32 %v3239_v50, %v4219_v10  ;;  %v2790_v59 = vld [vmem:[%s3590_s13 + $0x2c] sm:$0x7] }
 0x1b4   : > { %v2831_v58 = vpack.c.bf16 %v2322_v51, %v2322_v51  ;;  %v2296_v8 = vadd.f32 %v3203_v30, %v4219_v10  ;;  %v2323_v48 = vmax.f32 %v2307_v34, 0.0  ;;  %v3211_v54 = vadd.f32 %v4194_v4, %v2213_v56 }
 0x1b5   : > { %v2314_v60 = vmax.f32 %v2298_v57, 0.0  ;;  %v2829_v43 = vpack.c.bf16 %v2320_v3, %v2320_v3  ;;  %v2299_v6 = vadd.f32 %v3207_v55, %v4219_v10  ;;  %v2321_v47 = vmax.f32 %v2305_v53, 0.0  ;;  %v3178_v49 = vpop.f32.mrb[12].mxu1  ;;  %v2800_v55 = vld [vmem:[%s3590_s13 + $0x3c] sm:$0x7] }
 0x1b6   : > { %2789 = vst.msk [vmem:[%s3590_s13 + $0x28] sm:$0xf] %vm2343_vm12, %v2831_v58  ;;  %v2312_v13 = vmax.f32 %v2296_v8, 0.0  ;;  %v2832_v52 = vpack.c.bf16 %v2323_v48, %v2323_v48  ;;  %v2297_v4 = vadd.f32 %v3211_v54, %v4219_v10  ;;  %v3242_v45 = vadd.f32 %v3241_v63, %v3178_v49  ;;  %v2258_v23 = vpop.f32.mrb[13].mxu1 }
 0x1b7   : > { %v2823_v5 = vpack.c.bf16 %v2314_v60, %v2314_v60  ;;  %2784 = vst.msk [vmem:[%s3590_s13 + $0x20] sm:$0xf] %vm2343_vm12, %v2829_v43  ;;  %v2315_v14 = vmax.f32 %v2299_v6, 0.0  ;;  %v2830_v7 = vpack.c.bf16 %v2321_v47, %v2321_v47  ;;  %v3245_v32 = vadd.f32 %v3244_v62, %v2258_v23  ;;  %v3179_v1 = vpop.f32.mrb[14].mxu1  ;;  %v2775_v60 = vld [vmem:[%s3590_s13 + $0x14] sm:$0x7] }
 0x1b8   : > { %v2821_v39 = vpack.c.bf16 %v2312_v13, %v2312_v13  ;;  %v2409_v27 = vsel %vm4233_vm15, %v2832_v52, %v2790_v59  ;;  %v2313_v33 = vmax.f32 %v2297_v4, 0.0  ;;  %v3170_v2 = vpop.f32.mrb[68].mxu0  ;;  %v2310_v19 = vadd.f32 %v3242_v45, %v4219_v10  ;;  %v2261_v22 = vpop.f32.mrb[15].mxu1  ;;  %v2795_v47 = vld [vmem:[%s3590_s13 + $0x34] sm:$0x7] }
 0x1b9   : > { %2769 = vst.msk [vmem:[%s3590_s13 + $0x8] sm:$0xf] %vm2343_vm12, %v2823_v5  ;;  %v2824_v17 = vpack.c.bf16 %v2315_v14, %v2315_v14  ;;  %2791 = vst [vmem:[%s3590_s13 + $0x2c] sm:$0x7] %v2409_v27  ;;  %v2397_v62 = vsel %vm4233_vm15, %v2830_v7, %v2785_v20  ;;  %v3215_v26 = vadd.f32 %v4201_v31, %v3170_v2  ;;  %v2226_v35 = vpop.f32.mrb[69].mxu0 }
 0x1ba   : > { %v2308_v63 = vadd.f32 %v3245_v32, %v4219_v10  ;;  %2344 = vst.msk [vmem:[%s3590_s13] sm:$0xf] %vm2343_vm12, %v2821_v39  ;;  %v2822_v37 = vpack.c.bf16 %v2313_v33, %v2313_v33  ;;  %2786 = vst [vmem:[%s3590_s13 + $0x24] sm:$0x7] %v2397_v62  ;;  %v2326_v9 = vmax.f32 %v2310_v19, 0.0  ;;  %v3219_v38 = vadd.f32 %v4204_v28, %v2226_v35  ;;  %v3171_v11 = vpop.f32.mrb[70].mxu0 }
 0x1bb   : > { %v3248_v12 = vadd.f32 %v4221_v18, %v3179_v1  ;;  %v2361_v21 = vsel %vm4233_vm15, %v2824_v17, %v2770_v15  ;;  %v2302_v31 = vadd.f32 %v3215_v26, %v4219_v10  ;;  %v3223_v41 = vadd.f32 %v4206_v29, %v3171_v11  ;;  %v2229_v42 = vpop.f32.mrb[71].mxu0 }
 0x1bc   : > { %v2324_v16 = vmax.f32 %v2308_v63, 0.0  ;;  %2771 = vst [vmem:[%s3590_s13 + $0xc] sm:$0x7] %v2361_v21  ;;  %v2349_v36 = vsel %vm4233_vm15, %v2822_v37, %v2348_v24  ;;  %v2835_v28 = vpack.c.bf16 %v2326_v9, %v2326_v9  ;;  %v2300_v25 = vadd.f32 %v3219_v38, %v4219_v10 }
 0x1bd   : > { %v2311_v18 = vadd.f32 %v3248_v12, %v4219_v10  ;;  %2350 = vst [vmem:[%s3590_s13 + $0x4] sm:$0x7] %v2349_v36  ;;  %v2318_v46 = vmax.f32 %v2302_v31, 0.0  ;;  %v2303_v51 = vadd.f32 %v3223_v41, %v4219_v10  ;;  %v3227_v29 = vadd.f32 %v4208_v40, %v2229_v42  ;;  %v2780_v40 = vld [vmem:[%s3590_s13 + $0x1c] sm:$0x7] }
 0x1be   : > { %v2833_v50 = vpack.c.bf16 %v2324_v16, %v2324_v16  ;;  %2799 = vst.msk [vmem:[%s3590_s13 + $0x38] sm:$0xf] %vm2343_vm12, %v2835_v28  ;;  %v2316_v30 = vmax.f32 %v2300_v25, 0.0  ;;  %v3251_v34 = vadd.f32 %v4214_v0, %v2261_v22 }
 0x1bf   : > { %v2327_v44 = vmax.f32 %v2311_v18, 0.0  ;;  %v2827_v57 = vpack.c.bf16 %v2318_v46, %v2318_v46  ;;  %v2319_v3 = vmax.f32 %v2303_v51, 0.0  ;;  %v2301_v56 = vadd.f32 %v3227_v29, %v4219_v10 }
 0x1c0   : > { %2794 = vst.msk [vmem:[%s3590_s13 + $0x30] sm:$0xf] %vm2343_vm12, %v2833_v50  ;;  %v2825_v53 = vpack.c.bf16 %v2316_v30, %v2316_v30  ;;  %v2309_v8 = vadd.f32 %v3251_v34, %v4219_v10 }
 0x1c1   : > { %v2836_v58 = vpack.c.bf16 %v2327_v44, %v2327_v44  ;;  %2779 = vst.msk [vmem:[%s3590_s13 + $0x18] sm:$0xf] %vm2343_vm12, %v2827_v57  ;;  %v2828_v0 = vpack.c.bf16 %v2319_v3, %v2319_v3  ;;  %v2317_v48 = vmax.f32 %v2301_v56, 0.0  ;;  %2442 = sbr.rel (!%p3566_p5) target bundleno = 484 (0x1e4), region = 44 }
 0x1c2   : > { %2774 = vst.msk [vmem:[%s3590_s13 + $0x10] sm:$0xf] %vm2343_vm12, %v2825_v53  ;;  %v2325_v43 = vmax.f32 %v2309_v8, 0.0 }
 0x1c3   : > { %v2433_v54 = vsel %vm4233_vm15, %v2836_v58, %v2800_v55  ;;  %v2385_v6 = vsel %vm4233_vm15, %v2828_v0, %v2780_v40  ;;  %v2826_v59 = vpack.c.bf16 %v2317_v48, %v2317_v48 }
 0x1c4   : > { %2801 = vst [vmem:[%s3590_s13 + $0x3c] sm:$0x7] %v2433_v54  ;;  %2781 = vst [vmem:[%s3590_s13 + $0x1c] sm:$0x7] %v2385_v6  ;;  %v2834_v10 = vpack.c.bf16 %v2325_v43, %v2325_v43 }
 0x1c5   : > { %v2373_v49 = vsel %vm4233_vm15, %v2826_v59, %v2775_v60 }
 0x1c6   : > { %2776 = vst [vmem:[%s3590_s13 + $0x14] sm:$0x7] %v2373_v49  ;;  %v2421_v13 = vsel %vm4233_vm15, %v2834_v10, %v2795_v47 }
 0x1c7   : > { %2796 = vst [vmem:[%s3590_s13 + $0x34] sm:$0x7] %v2421_v13 }
 0x1c8   : > { %s4389_s20 = smov (!%p2445_p13, %s2444_s20), 8 }
 0x1c9   : > { %s4307_s22 = sshll.u32 %s4389_s20, 7 }
 0x1ca   : > { %s2450_s23 = ssub.s32 1024, %s4307_s22 }
 0x1cb   : > { %2451 = vsyncadd %s4302_s14, %s2450_s23  ;;  %p2806_p0 = scmp.ne.s32.totalorder %s4307_s22, 0  ;;  %s2839_s27 = sshll.u32 %s3549_s19, 10 }
 0x1cc   : > { %s4316_s29 = scalar_lea.hbm %s4367_s4, %s2839_s27  ;;  %s2458_s30 = sshll.u32 %s3590_s13, 4  ;;  %s4319_s30 = int_to_ptr.vmem [resolvable:$true] %s2458_s30 }
 0x1cd   : > { %s3435_s5 = scalar_lea.vmem %s4319_s30, %s4307_s22  ;;  %s3500_s6 = smov [#allocation3]  }
 0x1ce   : > { %p3436_p1 = scmp.ne.s32.totalorder %s4319_s30, %s3435_s5  ;;  %s3439_s8 = sshll.u32 %s3500_s6, 4  ;;  %s3440_s8 = int_to_ptr.vmem [resolvable:$false] %s3439_s8 }
 0x1cf   : > { %s3441_s19 = scalar_lea.vmem %s3440_s8, 2048  ;;  %p3442_p4 = scmp.lt.s32.totalorder %s4319_s30, %s3440_s8 }
 0x1d0   : > { %p3437_p2 = pnand %p3436_p1, %p2806_p0  ;;  %p3443_p5 = scmp.lt.s32.totalorder %s3441_s19, %s3435_s5 }
 0x1d2   : > { %p3438_p3 = pneg %p3437_p2  ;;  %p3444_p7 = por %p3443_p5, %p3442_p4 }
 0x1d4   : > { %p3445_p8 = pnand %p3444_p7, %p3438_p3 }
 0x1d6   : > { %3448 = shalt.err (!%p3445_p8)
}
 0x1d7   : > { %s3449_s13 = scalar_lea.hbm %s4316_s29, %s4307_s22  ;;  %s3453_s10 = scalar_lea.hbm %s4367_s4, 1664 }
 0x1d8   : > { %p3450_p9 = scmp.ne.s32.totalorder %s4316_s29, %s3449_s13  ;;  %p3454_p12 = scmp.lt.u32.totalorder %s4316_s29, %s4367_s4 }
 0x1d9   : > { %p3455_p13 = scmp.lt.u32.totalorder %s3453_s10, %s3449_s13  ;;  %p3457_p2 = scmp.lt.u32.totalorder %s3449_s13, %s4316_s29 }
 0x1da   : > { %p3451_p10 = pnand %p3450_p9, %p2806_p0 }
 0x1db   : > { %p3456_p1 = por %p3455_p13, %p3454_p12 }
 0x1dc   : > { %p3452_p11 = pneg %p3451_p10 }
 0x1dd   : > { %p3458_p3 = por %p3457_p2, %p3456_p1 }
 0x1df   : > { %p3459_p4 = pnand %p3458_p3, %p3452_p11 }
 0x1e1   : > { %3462 = shalt.err (!%p3459_p4)
}
 0x1e2   : > { %s3501_s20 = smov 64   ;;  %s3502_s23 = smov 4  }
 0x1e3   : > { %2464 = dma.vmem_to_hbm [thread:$0]  (%p2806_p0), %s4319_s30, %s4307_s22, %s4316_s29, %s4302_s14, %s3501_s20, %s3501_s20, %s3502_s23  }
 0x1e4 PF: > { %p3281_p5 = scmp.ge.s32.totalorder %s3497_s18, 2  ;;  %s2473_s27 = sand.u32 1, %s3485_s15  }
 0x1e5   : > { %s2474_s25 = scalar_lea.sflag [#allocation4], %s2473_s27 }
 0x1e6   : > { %p3278_p7 = pnand %p3281_p5, %p3570_p6 }
 0x1e8   : > { %3480 = dma.done.wait (!%p3278_p7), %s2474_s25, 1024  }
 0x1e9   : > { %3482 = vsyncadd (!%p3278_p7), %s2474_s25, 4294966272  ;;  %p14_p8 = scmp.ge.s32.totalorder %s3553_s21, 4   ;;  %s4380_s15 = smov %s3489_s16 }
 0x1ea   : > { %s4381_s16 = smov %s3493_s17  ;;  %s4382_s17 = smov %s3564_s24 }
 0x1eb   : > { %s4383_s18 = smov %s3553_s21  ;;  %16 = sbr.rel (!%p14_p8) target bundleno = 3 (0x3), region = 87 }
 0x1f2   :  { %2479 = vsyncpa [#allocation4], 1 }
 0x1f3   :  { %2481 = vsyncpa [#allocation4 + $0x1], 1 }

</bundles_post_ra>
